<compile_context>
chip_gen: v7x
topology: tpu7x:2x2x1
jax: 0.10.0
libtpu: 0.0.40
codegen_flags: <defaults>
</compile_context>

<pallas_src>
import functools

import jax
import jax.numpy as jnp
from jax import lax
from jax.experimental import pallas as pl
from jax.experimental.pallas import tpu as pltpu


def _round_up(x, m):
    return ((x + m - 1) // m) * m


def _neg_logsigmoid(x):
    # -logsigmoid(x) = log1p(exp(-|x|)) - min(x, 0)   (numerically stable, f32)
    return jnp.log1p(jnp.exp(-jnp.abs(x))) - jnp.minimum(x, 0.0)


def _start_row_gather(tab_ref, ids_ref, base, buf, slot, sem, n_rows):
    """Async-gather rows tab[ids[base+r]] -> buf[slot, r] on one shared sem."""
    @pl.loop(0, n_rows)
    def _(r):
        idx = ids_ref[base + r]
        pltpu.make_async_copy(
            tab_ref.at[pl.ds(idx, 1), :],
            buf.at[slot, pl.ds(r, 1), :],
            sem,
        ).start()


def _wait_row_gather(tab_ref, buf, slot, sem, n_rows):
    """Wait for the n_rows row copies issued on `sem` (no SMEM index reads)."""
    @pl.loop(0, n_rows)
    def _(r):
        # Only the descriptor's shape matters for the wait amount, so reuse
        # table row 0 instead of re-reading the gathered index from SMEM.
        pltpu.make_async_copy(
            tab_ref.at[pl.ds(0, 1), :],
            buf.at[slot, pl.ds(r, 1), :],
            sem,
        ).wait()


def skipgram_loss_kernel(
    # scalar-prefetch refs (SMEM)
    c_ids_ref, p_ids_ref, n_ids_ref,
    # inputs: raw HBM refs (embedding tables, D padded to a multiple of 128)
    in_tab_ref, out_tab_ref,
    # output: (1, 1) f32 scalar loss, resident SMEM accumulator
    loss_ref,
    # scratch
    c_buf, p_buf, n_buf, c_sem, p_sem, n_sem,
    *, tile_b, k_pad, k_neg, b_true,
):
    step = pl.program_id(0)
    nsteps = pl.num_programs(0)
    slot = step % 2
    nslot = 1 - slot

    @pl.when(step == 0)
    def _init():
        loss_ref[0, 0] = jnp.float32(0.0)
        # Prime slot 0 with tile 0's center / positive rows.
        _start_row_gather(in_tab_ref, c_ids_ref, 0, c_buf, 0, c_sem.at[0], tile_b)
        _start_row_gather(out_tab_ref, p_ids_ref, 0, p_buf, 0, p_sem.at[0], tile_b)
        # Negatives (padded to k_pad) are shared by every batch tile: gather
        # them once into the persistent VMEM scratch.
        _start_row_gather(out_tab_ref, n_ids_ref, 0, n_buf, 0, n_sem.at[0], k_pad)

    # Prefetch the NEXT tile's rows into the other slot; these DMAs complete
    # under the current tile's matmul / logsigmoid work (double buffering).
    @pl.when(step + 1 < nsteps)
    def _prefetch_next():
        nbase = (step + 1) * tile_b
        _start_row_gather(in_tab_ref, c_ids_ref, nbase, c_buf, nslot,
                          c_sem.at[nslot], tile_b)
        _start_row_gather(out_tab_ref, p_ids_ref, nbase, p_buf, nslot,
                          p_sem.at[nslot], tile_b)

    # Wait for this tile's gathers (and, at step 0, the negatives).
    @pl.when(step == 0)
    def _wait_negs():
        _wait_row_gather(out_tab_ref, n_buf, 0, n_sem.at[0], k_pad)

    _wait_row_gather(in_tab_ref, c_buf, slot, c_sem.at[slot], tile_b)
    _wait_row_gather(out_tab_ref, p_buf, slot, p_sem.at[slot], tile_b)

    c = c_buf[slot]                      # (tile_b, D_pad), table dtype
    p = p_buf[slot]                      # (tile_b, D_pad)
    n = n_buf[0]                         # (k_pad, D_pad)

    # Positive score: per-row dot (elementwise multiply + lane reduce, f32 on
    # the VPU/XLU slots; keep f32 for v5e which has no bf16 VPU/EUP).
    c32 = c.astype(jnp.float32)
    p32 = p.astype(jnp.float32)
    pos_dot = jnp.sum(c32 * p32, axis=-1, keepdims=True)              # (tile_b, 1)

    # Negative scores: MXU matmul contracting over D_pad, f32 accumulation;
    # operands stay in the table dtype.
    neg_dot = lax.dot_general(
        c, n,
        dimension_numbers=(((1,), (1,)), ((), ())),
        preferred_element_type=jnp.float32,
    )                                                                  # (tile_b, k_pad)

    log_pos = _neg_logsigmoid(pos_dot)                                 # (tile_b, 1)
    log_neg_all = _neg_logsigmoid(neg_dot)                             # (tile_b, k_pad)
    if k_pad != k_neg:
        # Padded negative columns are real dot products against row n_ids[0];
        # they MUST be masked out before the sum to keep the loss exact.
        col = lax.broadcasted_iota(jnp.int32, (tile_b, k_pad), 1)
        log_neg_all = jnp.where(col < k_neg, log_neg_all, 0.0)
    log_neg = jnp.sum(log_neg_all, axis=-1, keepdims=True)             # (tile_b, 1)

    # Mask batch-padding rows so they contribute nothing to the mean.
    row = step * tile_b + lax.broadcasted_iota(jnp.int32, (tile_b, 1), 0)
    valid = (row < b_true).astype(jnp.float32)
    partial_sum = jnp.sum(valid * (log_pos + log_neg))

    loss_ref[0, 0] += partial_sum

    @pl.when(step == nsteps - 1)
    def _finalize():
        # Mean over the TRUE batch size (not the padded one).
        loss_ref[0, 0] = loss_ref[0, 0] / jnp.float32(b_true)


def skipgram_forward(input_embeddings, output_embeddings,
                     center_words, positive_words, negative_words,
                     *, tile_b=128):
    """Fused gather + skip-gram negative-sampling loss.  Returns scalar f32."""
    vocab_n, embed_d = input_embeddings.shape
    b_true = int(center_words.shape[0])
    k_neg = int(negative_words.shape[0])

    # Lane/MXU-align the embedding dim and the negative count.  Zero columns
    # do not change any dot product; padded negative columns are masked
    # in-kernel, padded batch rows are masked in-kernel.
    d_pad = _round_up(embed_d, 128)
    k_pad = _round_up(k_neg, 128)

    in_tab = input_embeddings
    out_tab = output_embeddings
    if d_pad != embed_d:
        in_tab = jnp.pad(in_tab, ((0, 0), (0, d_pad - embed_d)))
        out_tab = jnp.pad(out_tab, ((0, 0), (0, d_pad - embed_d)))

    num_tiles = pl.cdiv(b_true, tile_b)
    b_pad = num_tiles * tile_b

    # Pad index arrays with a valid row id (0); padded rows are masked.
    c_ids = jnp.zeros((b_pad,), jnp.int32).at[:b_true].set(
        center_words.astype(jnp.int32))
    p_ids = jnp.zeros((b_pad,), jnp.int32).at[:b_true].set(
        positive_words.astype(jnp.int32))
    n_ids = jnp.zeros((k_pad,), jnp.int32).at[:k_neg].set(
        negative_words.astype(jnp.int32))

    kernel = functools.partial(
        skipgram_loss_kernel,
        tile_b=tile_b, k_pad=k_pad, k_neg=k_neg, b_true=b_true)

    grid_spec = pltpu.PrefetchScalarGridSpec(
        num_scalar_prefetch=3,
        grid=(num_tiles,),
        in_specs=[
            pl.BlockSpec(memory_space=pl.ANY),   # input_embeddings  (HBM)
            pl.BlockSpec(memory_space=pl.ANY),   # output_embeddings (HBM)
        ],
        out_specs=pl.BlockSpec(
            (1, 1), lambda i, *_: (0, 0),
            memory_space=pltpu.MemorySpace.SMEM),
        scratch_shapes=[
            pltpu.VMEM((2, tile_b, d_pad), in_tab.dtype),    # center rows (dbl buf)
            pltpu.VMEM((2, tile_b, d_pad), out_tab.dtype),   # positive rows (dbl buf)
            pltpu.VMEM((1, k_pad, d_pad), out_tab.dtype),    # negative rows (persistent)
            pltpu.SemaphoreType.DMA((2,)),                   # center gather sems (per slot)
            pltpu.SemaphoreType.DMA((2,)),                   # positive gather sems (per slot)
            pltpu.SemaphoreType.DMA((1,)),                   # negative gather sem
        ],
    )

    out = pl.pallas_call(
        kernel,
        out_shape=jax.ShapeDtypeStruct((1, 1), jnp.float32),
        grid_spec=grid_spec,
        compiler_params=pltpu.CompilerParams(
            # Single grid axis accumulates into one resident SMEM scalar ->
            # it must run sequentially.
            dimension_semantics=("arbitrary",),
        ),
    )(c_ids, p_ids, n_ids, in_tab, out_tab)
    return out[0, 0]


if __name__ == "__main__":
    # Small synthetic config consistent with the module's forward.
    VOCAB_N = 64      # vocab.N
    EMBED_D = 32      # embedding_dim (padded to 128 lanes inside the wrapper)
    BATCH = 200       # not a multiple of TILE_B -> exercises batch-row masking
    NUM_NEG = 8       # negative samples (padded to 128 + column mask)
    TILE_B = 128      # batch tile -> grid of 2 steps, exercises double buffering

    key = jax.random.PRNGKey(0)
    k_in, k_out, k_c, k_p, k_n = jax.random.split(key, 5)

    # nn.Embedding default init ~ N(0, 1); deterministic from PRNGKey(0).
    input_embeddings = jax.random.normal(k_in, (VOCAB_N, EMBED_D), dtype=jnp.float32)
    output_embeddings = jax.random.normal(k_out, (VOCAB_N, EMBED_D), dtype=jnp.float32)

    center_words = jax.random.randint(k_c, (BATCH,), 0, VOCAB_N, dtype=jnp.int32)
    positive_words = jax.random.randint(k_p, (BATCH,), 0, VOCAB_N, dtype=jnp.int32)
    negative_words = jax.random.randint(k_n, (NUM_NEG,), 0, VOCAB_N, dtype=jnp.int32)

    loss = skipgram_forward(input_embeddings, output_embeddings,
                            center_words, positive_words, negative_words,
                            tile_b=TILE_B)
    loss = jax.block_until_ready(loss)

    # Pure-JAX reference (mirrors the PyTorch broadcast exactly) for sanity.
    c = input_embeddings[center_words]
    p = output_embeddings[positive_words]
    n = output_embeddings[negative_words]
    pos_dot = jnp.einsum('bd,bd->b', c, p).reshape(BATCH, 1, 1)
    neg_dot = c @ n.T
    log_pos = -jax.nn.log_sigmoid(pos_dot)
    log_neg = (-jax.nn.log_sigmoid(neg_dot)).sum(1)
    ref = jnp.mean(log_pos + log_neg)   # broadcasts (B,1,1)+(B,) -> (B,1,B)

    assert jnp.allclose(loss, ref, rtol=2e-4, atol=2e-4), (loss, ref)
    print("KERNEL_OK")
</pallas_src>

<mosaic_0001>
module attributes {stable_mosaic.version = 11 : i64} {
  func.func @skipgram_loss_kernel(%arg0: i32, %arg1: memref<256xi32, #tpu.memory_space<smem>>, %arg2: memref<256xi32, #tpu.memory_space<smem>>, %arg3: memref<128xi32, #tpu.memory_space<smem>>, %arg4: memref<64x128xf32, #tpu.memory_space<any>>, %arg5: memref<64x128xf32, #tpu.memory_space<any>>, %arg6: memref<1x1xf32, #tpu.memory_space<smem>>, %arg7: memref<2x128x128xf32, #tpu.memory_space<vmem>>, %arg8: memref<2x128x128xf32, #tpu.memory_space<vmem>>, %arg9: memref<1x128x128xf32, #tpu.memory_space<vmem>>, %arg10: memref<2x!tpu.dma_semaphore, #tpu.memory_space<semaphore_mem>>, %arg11: memref<2x!tpu.dma_semaphore, #tpu.memory_space<semaphore_mem>>, %arg12: memref<1x!tpu.dma_semaphore, #tpu.memory_space<semaphore_mem>>) attributes {dimension_semantics = [#tpu.dimension_semantics<arbitrary>], iteration_bounds = array<i64: 2>, scalar_prefetch = 3 : i64, scratch_operands = 6 : i64, tpu.core_type = #tpu.core_type<tc>, window_params = [{}, {}, {transform_indices = @transform_2, window_bounds = array<i64: 1, 1>}]} {
    %c2_i32 = arith.constant 2 : i32
    %c0_i32 = arith.constant 0 : i32
    %0 = arith.cmpi eq, %c2_i32, %c0_i32 : i32
    %c1_i32 = arith.constant 1 : i32
    %1 = arith.select %0, %c1_i32, %c2_i32 : i32
    %2 = arith.remsi %arg0, %1 : i32
    %c0_i32_0 = arith.constant 0 : i32
    %3 = arith.cmpi ne, %2, %c0_i32_0 : i32
    %c0_i32_1 = arith.constant 0 : i32
    %4 = arith.cmpi slt, %2, %c0_i32_1 : i32
    %c0_i32_2 = arith.constant 0 : i32
    %5 = arith.cmpi slt, %1, %c0_i32_2 : i32
    %6 = arith.xori %4, %5 : i1
    %7 = arith.andi %6, %3 : i1
    %8 = arith.addi %2, %1 : i32
    %9 = arith.select %7, %8, %2 : i32
    %c1_i32_3 = arith.constant 1 : i32
    %10 = arith.subi %c1_i32_3, %9 : i32
    %c0_i32_4 = arith.constant 0 : i32
    %11 = arith.cmpi eq, %arg0, %c0_i32_4 : i32
    %12 = arith.extui %11 : i1 to i32
    %c0_i32_5 = arith.constant 0 : i32
    %13 = arith.cmpi ne, %12, %c0_i32_5 : i32
    scf.if %13 {
      %cst_39 = arith.constant 0.000000e+00 : f32
      %c0_40 = arith.constant 0 : index
      %c0_41 = arith.constant 0 : index
      %78 = memref.load %arg6[%c0_40, %c0_41] : memref<1x1xf32, #tpu.memory_space<smem>>
      memref.store %cst_39, %arg6[%c0_40, %c0_41] : memref<1x1xf32, #tpu.memory_space<smem>>
      %c0_i32_42 = arith.constant 0 : i32
      %c0_i32_43 = arith.constant 0 : i32
      %c128_i32_44 = arith.constant 128 : i32
      %79 = arith.addi %c0_i32_43, %c128_i32_44 : i32
      %c1_i32_45 = arith.constant 1 : i32
      scf.for %arg13 = %c0_i32_43 to %79 step %c1_i32_45  : i32 {
        %c1_i32_57 = arith.constant 1 : i32
        %82 = arith.muli %arg13, %c1_i32_57 : i32
        %c0_i32_58 = arith.constant 0 : i32
        %83 = arith.addi %c0_i32_58, %82 : i32
        %c0_i32_59 = arith.constant 0 : i32
        %84 = arith.addi %c0_i32_59, %83 : i32
        %85 = arith.index_cast %84 : i32 to index
        %86 = memref.load %arg1[%85] : memref<256xi32, #tpu.memory_space<smem>>
        %c0_i32_60 = arith.constant 0 : i32
        %c0_i32_61 = arith.constant 0 : i32
        %87 = tpu.memref_slice %arg4[%86, %c0_i32_61] : memref<64x128xf32, #tpu.memory_space<any>> -> memref<1x128xf32, #tpu.memory_space<any>>
        %c0_i32_62 = arith.constant 0 : i32
        %88 = tpu.memref_slice %arg7[%c0_i32_60, %83, %c0_i32_62] : memref<2x128x128xf32, #tpu.memory_space<vmem>> -> memref<1x1x128xf32, #tpu.memory_space<vmem>>
        %89 = tpu.memref_squeeze %88 : memref<1x1x128xf32, #tpu.memory_space<vmem>> -> memref<1x128xf32, #tpu.memory_space<vmem>>
        %90 = tpu.memref_slice %arg10[%c0_i32_42] : memref<2x!tpu.dma_semaphore, #tpu.memory_space<semaphore_mem>> -> memref<1x!tpu.dma_semaphore, #tpu.memory_space<semaphore_mem>>
        %91 = tpu.memref_squeeze %90 : memref<1x!tpu.dma_semaphore, #tpu.memory_space<semaphore_mem>> -> memref<!tpu.dma_semaphore, #tpu.memory_space<semaphore_mem>>
        tpu.enqueue_dma source(%87 : memref<1x128xf32, #tpu.memory_space<any>>) target(%89 : memref<1x128xf32, #tpu.memory_space<vmem>>) target_semaphore(%91 : memref<!tpu.dma_semaphore, #tpu.memory_space<semaphore_mem>>)
      }
      %c128_i32_46 = arith.constant 128 : i32
      %c0_i32_47 = arith.constant 0 : i32
      %c0_i32_48 = arith.constant 0 : i32
      %c128_i32_49 = arith.constant 128 : i32
      %80 = arith.addi %c0_i32_48, %c128_i32_49 : i32
      %c1_i32_50 = arith.constant 1 : i32
      scf.for %arg13 = %c0_i32_48 to %80 step %c1_i32_50  : i32 {
        %c1_i32_57 = arith.constant 1 : i32
        %82 = arith.muli %arg13, %c1_i32_57 : i32
        %c0_i32_58 = arith.constant 0 : i32
        %83 = arith.addi %c0_i32_58, %82 : i32
        %c0_i32_59 = arith.constant 0 : i32
        %84 = arith.addi %c0_i32_59, %83 : i32
        %85 = arith.index_cast %84 : i32 to index
        %86 = memref.load %arg2[%85] : memref<256xi32, #tpu.memory_space<smem>>
        %c0_i32_60 = arith.constant 0 : i32
        %c0_i32_61 = arith.constant 0 : i32
        %87 = tpu.memref_slice %arg5[%86, %c0_i32_61] : memref<64x128xf32, #tpu.memory_space<any>> -> memref<1x128xf32, #tpu.memory_space<any>>
        %c0_i32_62 = arith.constant 0 : i32
        %88 = tpu.memref_slice %arg8[%c0_i32_60, %83, %c0_i32_62] : memref<2x128x128xf32, #tpu.memory_space<vmem>> -> memref<1x1x128xf32, #tpu.memory_space<vmem>>
        %89 = tpu.memref_squeeze %88 : memref<1x1x128xf32, #tpu.memory_space<vmem>> -> memref<1x128xf32, #tpu.memory_space<vmem>>
        %90 = tpu.memref_slice %arg11[%c0_i32_47] : memref<2x!tpu.dma_semaphore, #tpu.memory_space<semaphore_mem>> -> memref<1x!tpu.dma_semaphore, #tpu.memory_space<semaphore_mem>>
        %91 = tpu.memref_squeeze %90 : memref<1x!tpu.dma_semaphore, #tpu.memory_space<semaphore_mem>> -> memref<!tpu.dma_semaphore, #tpu.memory_space<semaphore_mem>>
        tpu.enqueue_dma source(%87 : memref<1x128xf32, #tpu.memory_space<any>>) target(%89 : memref<1x128xf32, #tpu.memory_space<vmem>>) target_semaphore(%91 : memref<!tpu.dma_semaphore, #tpu.memory_space<semaphore_mem>>)
      }
      %c128_i32_51 = arith.constant 128 : i32
      %c0_i32_52 = arith.constant 0 : i32
      %c0_i32_53 = arith.constant 0 : i32
      %c128_i32_54 = arith.constant 128 : i32
      %81 = arith.addi %c0_i32_53, %c128_i32_54 : i32
      %c1_i32_55 = arith.constant 1 : i32
      scf.for %arg13 = %c0_i32_53 to %81 step %c1_i32_55  : i32 {
        %c1_i32_57 = arith.constant 1 : i32
        %82 = arith.muli %arg13, %c1_i32_57 : i32
        %c0_i32_58 = arith.constant 0 : i32
        %83 = arith.addi %c0_i32_58, %82 : i32
        %c0_i32_59 = arith.constant 0 : i32
        %84 = arith.addi %c0_i32_59, %83 : i32
        %85 = arith.index_cast %84 : i32 to index
        %86 = memref.load %arg3[%85] : memref<128xi32, #tpu.memory_space<smem>>
        %c0_i32_60 = arith.constant 0 : i32
        %c0_i32_61 = arith.constant 0 : i32
        %87 = tpu.memref_slice %arg5[%86, %c0_i32_61] : memref<64x128xf32, #tpu.memory_space<any>> -> memref<1x128xf32, #tpu.memory_space<any>>
        %c0_i32_62 = arith.constant 0 : i32
        %88 = tpu.memref_slice %arg9[%c0_i32_60, %83, %c0_i32_62] : memref<1x128x128xf32, #tpu.memory_space<vmem>> -> memref<1x1x128xf32, #tpu.memory_space<vmem>>
        %89 = tpu.memref_squeeze %88 : memref<1x1x128xf32, #tpu.memory_space<vmem>> -> memref<1x128xf32, #tpu.memory_space<vmem>>
        %90 = tpu.memref_slice %arg12[%c0_i32_52] : memref<1x!tpu.dma_semaphore, #tpu.memory_space<semaphore_mem>> -> memref<1x!tpu.dma_semaphore, #tpu.memory_space<semaphore_mem>>
        %91 = tpu.memref_squeeze %90 : memref<1x!tpu.dma_semaphore, #tpu.memory_space<semaphore_mem>> -> memref<!tpu.dma_semaphore, #tpu.memory_space<semaphore_mem>>
        tpu.enqueue_dma source(%87 : memref<1x128xf32, #tpu.memory_space<any>>) target(%89 : memref<1x128xf32, #tpu.memory_space<vmem>>) target_semaphore(%91 : memref<!tpu.dma_semaphore, #tpu.memory_space<semaphore_mem>>)
      }
      %c128_i32_56 = arith.constant 128 : i32
    } else {
    }
    %c1_i32_6 = arith.constant 1 : i32
    %14 = arith.addi %arg0, %c1_i32_6 : i32
    %c2_i32_7 = arith.constant 2 : i32
    %15 = arith.cmpi slt, %14, %c2_i32_7 : i32
    %16 = arith.extui %15 : i1 to i32
    %c0_i32_8 = arith.constant 0 : i32
    %17 = arith.cmpi ne, %16, %c0_i32_8 : i32
    scf.if %17 {
      %c1_i32_39 = arith.constant 1 : i32
      %78 = arith.addi %arg0, %c1_i32_39 : i32
      %c128_i32_40 = arith.constant 128 : i32
      %79 = arith.muli %78, %c128_i32_40 : i32
      %c0_i32_41 = arith.constant 0 : i32
      %c128_i32_42 = arith.constant 128 : i32
      %80 = arith.addi %c0_i32_41, %c128_i32_42 : i32
      %c1_i32_43 = arith.constant 1 : i32
      scf.for %arg13 = %c0_i32_41 to %80 step %c1_i32_43  : i32 {
        %c1_i32_49 = arith.constant 1 : i32
        %82 = arith.muli %arg13, %c1_i32_49 : i32
        %c0_i32_50 = arith.constant 0 : i32
        %83 = arith.addi %c0_i32_50, %82 : i32
        %84 = arith.addi %79, %83 : i32
        %85 = arith.index_cast %84 : i32 to index
        %86 = memref.load %arg1[%85] : memref<256xi32, #tpu.memory_space<smem>>
        %c0_i32_51 = arith.constant 0 : i32
        %87 = tpu.memref_slice %arg4[%86, %c0_i32_51] : memref<64x128xf32, #tpu.memory_space<any>> -> memref<1x128xf32, #tpu.memory_space<any>>
        %c0_i32_52 = arith.constant 0 : i32
        %88 = tpu.memref_slice %arg7[%10, %83, %c0_i32_52] : memref<2x128x128xf32, #tpu.memory_space<vmem>> -> memref<1x1x128xf32, #tpu.memory_space<vmem>>
        %89 = tpu.memref_squeeze %88 : memref<1x1x128xf32, #tpu.memory_space<vmem>> -> memref<1x128xf32, #tpu.memory_space<vmem>>
        %90 = tpu.memref_slice %arg10[%10] : memref<2x!tpu.dma_semaphore, #tpu.memory_space<semaphore_mem>> -> memref<1x!tpu.dma_semaphore, #tpu.memory_space<semaphore_mem>>
        %91 = tpu.memref_squeeze %90 : memref<1x!tpu.dma_semaphore, #tpu.memory_space<semaphore_mem>> -> memref<!tpu.dma_semaphore, #tpu.memory_space<semaphore_mem>>
        tpu.enqueue_dma source(%87 : memref<1x128xf32, #tpu.memory_space<any>>) target(%89 : memref<1x128xf32, #tpu.memory_space<vmem>>) target_semaphore(%91 : memref<!tpu.dma_semaphore, #tpu.memory_space<semaphore_mem>>)
      }
      %c128_i32_44 = arith.constant 128 : i32
      %c0_i32_45 = arith.constant 0 : i32
      %c128_i32_46 = arith.constant 128 : i32
      %81 = arith.addi %c0_i32_45, %c128_i32_46 : i32
      %c1_i32_47 = arith.constant 1 : i32
      scf.for %arg13 = %c0_i32_45 to %81 step %c1_i32_47  : i32 {
        %c1_i32_49 = arith.constant 1 : i32
        %82 = arith.muli %arg13, %c1_i32_49 : i32
        %c0_i32_50 = arith.constant 0 : i32
        %83 = arith.addi %c0_i32_50, %82 : i32
        %84 = arith.addi %79, %83 : i32
        %85 = arith.index_cast %84 : i32 to index
        %86 = memref.load %arg2[%85] : memref<256xi32, #tpu.memory_space<smem>>
        %c0_i32_51 = arith.constant 0 : i32
        %87 = tpu.memref_slice %arg5[%86, %c0_i32_51] : memref<64x128xf32, #tpu.memory_space<any>> -> memref<1x128xf32, #tpu.memory_space<any>>
        %c0_i32_52 = arith.constant 0 : i32
        %88 = tpu.memref_slice %arg8[%10, %83, %c0_i32_52] : memref<2x128x128xf32, #tpu.memory_space<vmem>> -> memref<1x1x128xf32, #tpu.memory_space<vmem>>
        %89 = tpu.memref_squeeze %88 : memref<1x1x128xf32, #tpu.memory_space<vmem>> -> memref<1x128xf32, #tpu.memory_space<vmem>>
        %90 = tpu.memref_slice %arg11[%10] : memref<2x!tpu.dma_semaphore, #tpu.memory_space<semaphore_mem>> -> memref<1x!tpu.dma_semaphore, #tpu.memory_space<semaphore_mem>>
        %91 = tpu.memref_squeeze %90 : memref<1x!tpu.dma_semaphore, #tpu.memory_space<semaphore_mem>> -> memref<!tpu.dma_semaphore, #tpu.memory_space<semaphore_mem>>
        tpu.enqueue_dma source(%87 : memref<1x128xf32, #tpu.memory_space<any>>) target(%89 : memref<1x128xf32, #tpu.memory_space<vmem>>) target_semaphore(%91 : memref<!tpu.dma_semaphore, #tpu.memory_space<semaphore_mem>>)
      }
      %c128_i32_48 = arith.constant 128 : i32
    } else {
    }
    %c0_i32_9 = arith.constant 0 : i32
    %18 = arith.cmpi eq, %arg0, %c0_i32_9 : i32
    %19 = arith.extui %18 : i1 to i32
    %c0_i32_10 = arith.constant 0 : i32
    %20 = arith.cmpi ne, %19, %c0_i32_10 : i32
    scf.if %20 {
      %c0_i32_39 = arith.constant 0 : i32
      %c0_i32_40 = arith.constant 0 : i32
      %c128_i32_41 = arith.constant 128 : i32
      %78 = arith.addi %c0_i32_40, %c128_i32_41 : i32
      %c1_i32_42 = arith.constant 1 : i32
      scf.for %arg13 = %c0_i32_40 to %78 step %c1_i32_42  : i32 {
        %c1_i32_44 = arith.constant 1 : i32
        %79 = arith.muli %arg13, %c1_i32_44 : i32
        %c0_i32_45 = arith.constant 0 : i32
        %80 = arith.addi %c0_i32_45, %79 : i32
        %c0_i32_46 = arith.constant 0 : i32
        %c0_i32_47 = arith.constant 0 : i32
        %c0_i32_48 = arith.constant 0 : i32
        %81 = tpu.memref_slice %arg5[%c0_i32_47, %c0_i32_48] : memref<64x128xf32, #tpu.memory_space<any>> -> memref<1x128xf32, #tpu.memory_space<any>>
        %c0_i32_49 = arith.constant 0 : i32
        %82 = tpu.memref_slice %arg9[%c0_i32_46, %80, %c0_i32_49] : memref<1x128x128xf32, #tpu.memory_space<vmem>> -> memref<1x1x128xf32, #tpu.memory_space<vmem>>
        %83 = tpu.memref_squeeze %82 : memref<1x1x128xf32, #tpu.memory_space<vmem>> -> memref<1x128xf32, #tpu.memory_space<vmem>>
        %84 = tpu.memref_slice %arg12[%c0_i32_39] : memref<1x!tpu.dma_semaphore, #tpu.memory_space<semaphore_mem>> -> memref<1x!tpu.dma_semaphore, #tpu.memory_space<semaphore_mem>>
        %85 = tpu.memref_squeeze %84 : memref<1x!tpu.dma_semaphore, #tpu.memory_space<semaphore_mem>> -> memref<!tpu.dma_semaphore, #tpu.memory_space<semaphore_mem>>
        tpu.wait_dma2 semaphore(%85 : memref<!tpu.dma_semaphore, #tpu.memory_space<semaphore_mem>>) src(%81 : memref<1x128xf32, #tpu.memory_space<any>>) dst(%83 : memref<1x128xf32, #tpu.memory_space<vmem>>)
      }
      %c128_i32_43 = arith.constant 128 : i32
    } else {
    }
    %c0_i32_11 = arith.constant 0 : i32
    %c128_i32 = arith.constant 128 : i32
    %21 = arith.addi %c0_i32_11, %c128_i32 : i32
    %c1_i32_12 = arith.constant 1 : i32
    scf.for %arg13 = %c0_i32_11 to %21 step %c1_i32_12  : i32 {
      %c1_i32_39 = arith.constant 1 : i32
      %78 = arith.muli %arg13, %c1_i32_39 : i32
      %c0_i32_40 = arith.constant 0 : i32
      %79 = arith.addi %c0_i32_40, %78 : i32
      %c0_i32_41 = arith.constant 0 : i32
      %c0_i32_42 = arith.constant 0 : i32
      %80 = tpu.memref_slice %arg4[%c0_i32_41, %c0_i32_42] : memref<64x128xf32, #tpu.memory_space<any>> -> memref<1x128xf32, #tpu.memory_space<any>>
      %c0_i32_43 = arith.constant 0 : i32
      %81 = tpu.memref_slice %arg7[%9, %79, %c0_i32_43] : memref<2x128x128xf32, #tpu.memory_space<vmem>> -> memref<1x1x128xf32, #tpu.memory_space<vmem>>
      %82 = tpu.memref_squeeze %81 : memref<1x1x128xf32, #tpu.memory_space<vmem>> -> memref<1x128xf32, #tpu.memory_space<vmem>>
      %83 = tpu.memref_slice %arg10[%9] : memref<2x!tpu.dma_semaphore, #tpu.memory_space<semaphore_mem>> -> memref<1x!tpu.dma_semaphore, #tpu.memory_space<semaphore_mem>>
      %84 = tpu.memref_squeeze %83 : memref<1x!tpu.dma_semaphore, #tpu.memory_space<semaphore_mem>> -> memref<!tpu.dma_semaphore, #tpu.memory_space<semaphore_mem>>
      tpu.wait_dma2 semaphore(%84 : memref<!tpu.dma_semaphore, #tpu.memory_space<semaphore_mem>>) src(%80 : memref<1x128xf32, #tpu.memory_space<any>>) dst(%82 : memref<1x128xf32, #tpu.memory_space<vmem>>)
    }
    %c128_i32_13 = arith.constant 128 : i32
    %c0_i32_14 = arith.constant 0 : i32
    %c128_i32_15 = arith.constant 128 : i32
    %22 = arith.addi %c0_i32_14, %c128_i32_15 : i32
    %c1_i32_16 = arith.constant 1 : i32
    scf.for %arg13 = %c0_i32_14 to %22 step %c1_i32_16  : i32 {
      %c1_i32_39 = arith.constant 1 : i32
      %78 = arith.muli %arg13, %c1_i32_39 : i32
      %c0_i32_40 = arith.constant 0 : i32
      %79 = arith.addi %c0_i32_40, %78 : i32
      %c0_i32_41 = arith.constant 0 : i32
      %c0_i32_42 = arith.constant 0 : i32
      %80 = tpu.memref_slice %arg5[%c0_i32_41, %c0_i32_42] : memref<64x128xf32, #tpu.memory_space<any>> -> memref<1x128xf32, #tpu.memory_space<any>>
      %c0_i32_43 = arith.constant 0 : i32
      %81 = tpu.memref_slice %arg8[%9, %79, %c0_i32_43] : memref<2x128x128xf32, #tpu.memory_space<vmem>> -> memref<1x1x128xf32, #tpu.memory_space<vmem>>
      %82 = tpu.memref_squeeze %81 : memref<1x1x128xf32, #tpu.memory_space<vmem>> -> memref<1x128xf32, #tpu.memory_space<vmem>>
      %83 = tpu.memref_slice %arg11[%9] : memref<2x!tpu.dma_semaphore, #tpu.memory_space<semaphore_mem>> -> memref<1x!tpu.dma_semaphore, #tpu.memory_space<semaphore_mem>>
      %84 = tpu.memref_squeeze %83 : memref<1x!tpu.dma_semaphore, #tpu.memory_space<semaphore_mem>> -> memref<!tpu.dma_semaphore, #tpu.memory_space<semaphore_mem>>
      tpu.wait_dma2 semaphore(%84 : memref<!tpu.dma_semaphore, #tpu.memory_space<semaphore_mem>>) src(%80 : memref<1x128xf32, #tpu.memory_space<any>>) dst(%82 : memref<1x128xf32, #tpu.memory_space<vmem>>)
    }
    %c128_i32_17 = arith.constant 128 : i32
    %23 = arith.index_cast %9 : i32 to index
    %c0 = arith.constant 0 : index
    %c0_18 = arith.constant 0 : index
    %24 = vector.load %arg7[%23, %c0, %c0_18] : memref<2x128x128xf32, #tpu.memory_space<vmem>>, vector<1x128x128xf32>
    %25 = vector.shape_cast %24 : vector<1x128x128xf32> to vector<128x128xf32>
    %26 = arith.index_cast %9 : i32 to index
    %c0_19 = arith.constant 0 : index
    %c0_20 = arith.constant 0 : index
    %27 = vector.load %arg8[%26, %c0_19, %c0_20] : memref<2x128x128xf32, #tpu.memory_space<vmem>>, vector<1x128x128xf32>
    %28 = vector.shape_cast %27 : vector<1x128x128xf32> to vector<128x128xf32>
    %c0_21 = arith.constant 0 : index
    %c0_22 = arith.constant 0 : index
    %c0_23 = arith.constant 0 : index
    %29 = vector.load %arg9[%c0_21, %c0_22, %c0_23] : memref<1x128x128xf32, #tpu.memory_space<vmem>>, vector<1x128x128xf32>
    %30 = vector.shape_cast %29 : vector<1x128x128xf32> to vector<128x128xf32>
    %31 = arith.mulf %25, %28 : vector<128x128xf32>
    %cst = arith.constant dense<0.000000e+00> : vector<128xf32>
    %32 = vector.multi_reduction <add>, %31, %cst [1] : vector<128x128xf32> to vector<128xf32>
    %33 = vector.shape_cast %32 : vector<128xf32> to vector<128x1xf32>
    %cst_24 = arith.constant dense<0.000000e+00> : vector<128x128xf32>
    %34 = tpu.matmul %25, %30, %cst_24 {dimension_numbers = #tpu.dot_dimension_numbers<[1], [1], [0], [0], [0, 0, 1, 0], [], []>} : vector<128x128xf32>, vector<128x128xf32>, vector<128x128xf32> -> vector<128x128xf32>
    %35 = math.absf %33 : vector<128x1xf32>
    %cst_25 = arith.constant 0.000000e+00 : f32
    %36 = vector.broadcast %cst_25 : f32 to vector<128x1xf32>
    %37 = arith.subf %36, %35 : vector<128x1xf32>
    %38 = math.exp %37 : vector<128x1xf32>
    %39 = math.log1p %38 : vector<128x1xf32>
    %cst_26 = arith.constant 0.000000e+00 : f32
    %40 = vector.broadcast %cst_26 : f32 to vector<128x1xf32>
    %41 = arith.minimumf %33, %40 : vector<128x1xf32>
    %42 = arith.subf %39, %41 : vector<128x1xf32>
    %43 = math.absf %34 : vector<128x128xf32>
    %cst_27 = arith.constant 0.000000e+00 : f32
    %44 = vector.broadcast %cst_27 : f32 to vector<128x128xf32>
    %45 = arith.subf %44, %43 : vector<128x128xf32>
    %46 = math.exp %45 : vector<128x128xf32>
    %47 = math.log1p %46 : vector<128x128xf32>
    %cst_28 = arith.constant 0.000000e+00 : f32
    %48 = vector.broadcast %cst_28 : f32 to vector<128x128xf32>
    %49 = arith.minimumf %34, %48 : vector<128x128xf32>
    %50 = arith.subf %47, %49 : vector<128x128xf32>
    %51 = tpu.iota {dimensions = array<i32: 1>} : vector<128x128xi32>
    %c8_i32 = arith.constant 8 : i32
    %52 = vector.broadcast %c8_i32 : i32 to vector<128x128xi32>
    %53 = arith.cmpi slt, %51, %52 : vector<128x128xi32>
    %cst_29 = arith.constant 0.000000e+00 : f32
    %54 = vector.broadcast %cst_29 : f32 to vector<128x128xf32>
    %55 = arith.select %53, %50, %54 : vector<128x128xi1>, vector<128x128xf32>
    %cst_30 = arith.constant dense<0.000000e+00> : vector<128xf32>
    %56 = vector.multi_reduction <add>, %55, %cst_30 [1] : vector<128x128xf32> to vector<128xf32>
    %57 = vector.shape_cast %56 : vector<128xf32> to vector<128x1xf32>
    %c128_i32_31 = arith.constant 128 : i32
    %58 = arith.muli %arg0, %c128_i32_31 : i32
    %59 = tpu.iota {dimensions = array<i32: 0>} : vector<128x1xi32>
    %60 = vector.broadcast %58 : i32 to vector<128x1xi32>
    %61 = arith.addi %60, %59 : vector<128x1xi32>
    %c200_i32 = arith.constant 200 : i32
    %62 = vector.broadcast %c200_i32 : i32 to vector<128x1xi32>
    %63 = arith.cmpi slt, %61, %62 : vector<128x1xi32>
    %64 = arith.extui %63 : vector<128x1xi1> to vector<128x1xi32>
    %65 = arith.sitofp %64 : vector<128x1xi32> to vector<128x1xf32>
    %66 = arith.addf %42, %57 : vector<128x1xf32>
    %67 = arith.mulf %65, %66 : vector<128x1xf32>
    %68 = vector.shape_cast %67 : vector<128x1xf32> to vector<1x128x1xf32>
    %cst_32 = arith.constant dense<0.000000e+00> : vector<1xf32>
    %69 = vector.multi_reduction <add>, %68, %cst_32 [1, 2] : vector<1x128x1xf32> to vector<1xf32>
    %70 = vector.shape_cast %69 : vector<1xf32> to vector<1x1x1xf32>
    %71 = vector.extract %70[0, 0, 0] : f32 from vector<1x1x1xf32>
    %c0_33 = arith.constant 0 : index
    %c0_34 = arith.constant 0 : index
    %72 = memref.load %arg6[%c0_33, %c0_34] : memref<1x1xf32, #tpu.memory_space<smem>>
    %73 = arith.addf %72, %71 : f32
    %c0_35 = arith.constant 0 : index
    %c0_36 = arith.constant 0 : index
    %74 = memref.load %arg6[%c0_35, %c0_36] : memref<1x1xf32, #tpu.memory_space<smem>>
    memref.store %73, %arg6[%c0_35, %c0_36] : memref<1x1xf32, #tpu.memory_space<smem>>
    %c1_i32_37 = arith.constant 1 : i32
    %75 = arith.cmpi eq, %arg0, %c1_i32_37 : i32
    %76 = arith.extui %75 : i1 to i32
    %c0_i32_38 = arith.constant 0 : i32
    %77 = arith.cmpi ne, %76, %c0_i32_38 : i32
    scf.if %77 {
      %c0_39 = arith.constant 0 : index
      %c0_40 = arith.constant 0 : index
      %78 = memref.load %arg6[%c0_39, %c0_40] : memref<1x1xf32, #tpu.memory_space<smem>>
      %cst_41 = arith.constant 2.000000e+02 : f32
      %79 = arith.divf %78, %cst_41 : f32
      %c0_42 = arith.constant 0 : index
      %c0_43 = arith.constant 0 : index
      %80 = memref.load %arg6[%c0_42, %c0_43] : memref<1x1xf32, #tpu.memory_space<smem>>
      memref.store %79, %arg6[%c0_42, %c0_43] : memref<1x1xf32, #tpu.memory_space<smem>>
    } else {
    }
    return
  }
  func.func @transform_2(%arg0: i32, %arg1: memref<256xi32, #tpu.memory_space<smem>>, %arg2: memref<256xi32, #tpu.memory_space<smem>>, %arg3: memref<128xi32, #tpu.memory_space<smem>>) -> (i32, i32) {
    %c0_i32 = arith.constant 0 : i32
    %c0_i32_0 = arith.constant 0 : i32
    %c0_i32_1 = arith.constant 0 : i32
    return %c0_i32, %c0_i32_0 : i32, i32
  }
}

</mosaic_0001>

<bundles_post_ra>
// kernel: tpu_custom_call.1
= control target key start
LH: loop header
LB: loop body
LE: loop exit
PB: predicated region body
PF: predicated region fallthrough
CT: control target
= control target key end

     0   :  { %s2895_s0 = inlined_call_operand.hbm [shape: s32[256], index: 0, kind: input, shape index: {}]   ;;  %s2896_s3 = inlined_call_operand.hbm [shape: f32[64,128], index: 3, kind: input, shape index: {}]   ;;  %s2897_s4 = inlined_call_operand.hbm [shape: f32[64,128], index: 4, kind: input, shape index: {}]   ;;  %s2898_s5 = inlined_call_operand.hbm [shape: f32[1,1], index: 5, kind: output, shape index: {}]   ;;  %s2899_s1 = inlined_call_operand.vmem [shape: s32[256], index: 1, kind: input, shape index: {}]   ;;  %s2900_s2 = inlined_call_operand.vmem [shape: s32[128], index: 2, kind: input, shape index: {}]  }
   0x1   :  { %s1689_s20 = scalar_lea.hbm %s2895_s0, 32 }
   0x2   :  { %p1690_p0 = scmp.ne.s32.totalorder %s2895_s0, %s1689_s20  ;;  %p1693_p1 = scmp.lt.u32.totalorder %s1689_s20, %s2895_s0 }
   0x4   :  { %p1695_p2 = pnand %p1693_p1, %p1690_p0 }
   0x6   :  { %1698 = shalt.err (!%p1695_p2)  }
   0x7   :  { %s1939_s25 = smov [#allocation9]   ;;  %s12_s30 = sshll.u32 %s2899_s1, 4  ;;  %s13_s30 = int_to_ptr.vmem [resolvable:$true] %s12_s30 }
   0x8   :  { %11 = dma.hbm_to_smem %s2895_s0, 32, %s1939_s25, [#allocation8] }
   0x9   :  { %s16_s8 = sshll.u32 %s2900_s2, 4  ;;  %s1699_s9 = scalar_lea.vmem %s13_s30, 32  ;;  %s17_s8 = int_to_ptr.vmem [resolvable:$true] %s16_s8 }
   0xa   :  { %p1700_p3 = scmp.ne.s32.totalorder %s13_s30, %s1699_s9  ;;  %p1704_p4 = scmp.lt.s32.totalorder %s13_s30, %s13_s30 }
   0xb   :  { %p1705_p5 = scmp.lt.s32.totalorder %s1699_s9, %s1699_s9 }
   0xd   :  { %p1706_p6 = por %p1705_p5, %p1704_p4 }
   0xf   :  { %p1707_p7 = pnand %p1706_p6, %p1700_p3 }
  0x11   :  { %1710 = shalt.err (!%p1707_p7)  }
  0x12   :  { %s1940_s10 = smov [#allocation10]   ;;  %s1711_s0 = scalar_lea.vmem %s17_s8, 16 }
  0x13   :  { %15 = dma.vmem_to_smem %s13_s30, 32, %s1940_s10, [#allocation8] }
  0x14   :  { %p1712_p8 = scmp.ne.s32.totalorder %s17_s8, %s1711_s0  ;;  %p1716_p9 = scmp.lt.s32.totalorder %s17_s8, %s17_s8 }
  0x15   :  { %p1717_p10 = scmp.lt.s32.totalorder %s1711_s0, %s1711_s0 }
  0x17   :  { %p1718_p11 = por %p1717_p10, %p1716_p9 }
  0x19   :  { %p1719_p12 = pnand %p1718_p11, %p1712_p8 }
  0x1b   :  { %1722 = shalt.err (!%p1719_p12)  }
  0x1c   :  { %s1941_s1 = smov [#allocation11]  }
  0x1d   :  { %19 = dma.vmem_to_smem %s17_s8, 16, %s1941_s1, [#allocation8] }
  0x1e   :  { %1891 = dma.done.wait [#allocation8], 80 }
  0x1f   :  { %1892 = vsyncadd [#allocation8], 4294967216 }
  0x20   :  { %21 = sfence }
  0x21   :  { %22 = vsyncpa [#allocation13], 0  ;;  %s1998_s2 = smov 0  }
  0x22 LB: > { %p1291_p13 = scmp.ge.s32.totalorder %s1905_s2, 2  ;;  %s1905_s2 = sphi %s1998_s2, %s28_s2  }
  0x23   : > { %p51_p0 = scmp.lt.s32.totalorder (!%p1291_p13), %s1905_s2, 0  ;;  %s52_s11 = ssub.s32 (!%p1291_p13), 0, %s1905_s2 }
  0x24   : > { %48 = sbr.rel (%p1291_p13) target bundleno = 1011 (0x3f3), region = 12  ;;  %s1292_s12 = smin.u32 (!%p1291_p13), %s1905_s2, %s52_s11 }
  0x25   : > { %s54_s13 = sand.u32 (!%p1291_p13), 1, %s1292_s12   ;;  %p1295_p2 = scmp.ne.s32.totalorder (!%p1291_p13), %s1905_s2, 0 }
  0x26   : > { %s55_s14 = ssub.s32 (!%p1291_p13), 0, %s54_s13 }
  0x2b   : > { %s2969_s14 = smov (!%p51_p0, %s55_s14), %s54_s13  ;;  %67 = sbr.rel (%p1295_p2) target bundleno = 167 (0xa7), region = 16 }
  0x2c   : > { %p1294_p1 = scmp.lt.s32.totalorder %s2969_s14, 0  ;;  %s61_s15 = sadd.s32 2, %s2969_s14 }
  0x2d   : > { %s1942_s17 = smov (!%p1295_p2), 0.0   ;;  %s2015_s18 = smov (!%p1295_p2), 0  }
  0x2e   : > { %s2971_s15 = smov (!%p1294_p1, %s61_s15), %s2969_s14  ;;  %69 = sst [smem:[#allocation12]] (!%p1295_p2), %s1942_s17 }
  0x2f   : > { %s2010_s16 = ssub.s32 1, %s2971_s15 }
  0x32 LB: >> { %s76_s19 = sld [smem:[#allocation9 + %s1909_s18]]  ;;  %s79_s20 = scalar_lea.vmem [#allocation2], %s1909_s18  ;;  %s1909_s18 = sphi %s2015_s18, %s75_s18  }
  0x33   : >> { %s87_s21 = sshll.u32 %s79_s20, 4  ;;  %s1725_s29 = scalar_lea.hbm %s2896_s3, 1024  ;;  %s88_s21 = int_to_ptr.vmem [resolvable:$true] %s87_s21 }
  0x38   : >> { %s1296_s22 = sshll.u32 %s76_s19, 4 }
  0x39   : >> { %s78_s25 = scalar_lea.hbm %s2896_s3, %s1296_s22 }
  0x3a   : >> { %s1723_s26 = scalar_lea.hbm %s78_s25, 16  ;;  %p1726_p4 = scmp.lt.u32.totalorder %s78_s25, %s2896_s3 }
  0x3b   : >> { %p1724_p3 = scmp.ne.s32.totalorder %s78_s25, %s1723_s26  ;;  %p1727_p5 = scmp.lt.u32.totalorder %s1725_s29, %s1723_s26 }
  0x3c   : >> { %p1729_p7 = scmp.lt.u32.totalorder %s1723_s26, %s78_s25 }
  0x3d   : >> { %p1728_p6 = por %p1727_p5, %p1726_p4 }
  0x3f   : >> { %p1730_p8 = por %p1729_p7, %p1728_p6 }
  0x41   : >> { %p1731_p9 = pnand %p1730_p8, %p1724_p3 }
  0x43   : >> { %1734 = shalt.err (!%p1731_p9)  }
  0x44   : >> { %s1735_s7 = scalar_lea.vmem %s88_s21, 16  ;;  %s1943_s8 = smov [#allocation2]  }
  0x45   : >> { %p1736_p10 = scmp.ne.s32.totalorder %s88_s21, %s1735_s7  ;;  %s1737_s9 = sshll.u32 %s1943_s8, 4  ;;  %s1738_s9 = int_to_ptr.vmem [resolvable:$false] %s1737_s9 }
  0x46   : >> { %s1739_s10 = scalar_lea.vmem %s1738_s9, 4096  ;;  %p1740_p11 = scmp.lt.s32.totalorder %s88_s21, %s1738_s9 }
  0x47   : >> { %p1741_p12 = scmp.lt.s32.totalorder %s1739_s10, %s1735_s7 }
  0x49   : >> { %p1742_p13 = por %p1741_p12, %p1740_p11 }
  0x4b   : >> { %p1743_p0 = pnand %p1742_p13, %p1736_p10 }
  0x4d   : >> { %1746 = shalt.err (!%p1743_p0)  }
  0x4e   : >> { %90 = dma.hbm_to_vmem [thread:$0]  %s78_s25, 16, %s88_s21, [#allocation5] }
  0x4f   : >> { %s75_s18 = sadd.s32 1, %s1909_s18  }
  0x50   : >> { %p72_p1 = scmp.ge.s32.totalorder %s75_s18, 128  }
  0x51   : > { %s2034_s0 = smov (%p72_p1), 0  }
  0x52   : > { %74 = sbr.rel (!%p72_p1) target bundleno = 50 (0x32), region = 148 }
  0x59 LB: >> { %s97_s1 = sld [smem:[#allocation10 + %s1913_s0]]  ;;  %s100_s11 = scalar_lea.vmem [#allocation3], %s1913_s0  ;;  %s1913_s0 = sphi %s2034_s0, %s96_s0  }
  0x5a   : >> { %s108_s12 = sshll.u32 %s100_s11, 4  ;;  %s1749_s22 = scalar_lea.hbm %s2897_s4, 1024  ;;  %s109_s12 = int_to_ptr.vmem [resolvable:$true] %s108_s12 }
  0x5f   : >> { %s1297_s13 = sshll.u32 %s97_s1, 4 }
  0x60   : >> { %s99_s19 = scalar_lea.hbm %s2897_s4, %s1297_s13 }
  0x61   : >> { %s1747_s18 = scalar_lea.hbm %s99_s19, 16  ;;  %p1750_p4 = scmp.lt.u32.totalorder %s99_s19, %s2897_s4 }
  0x62   : >> { %p1748_p3 = scmp.ne.s32.totalorder %s99_s19, %s1747_s18  ;;  %p1751_p5 = scmp.lt.u32.totalorder %s1749_s22, %s1747_s18 }
  0x63   : >> { %p1753_p7 = scmp.lt.u32.totalorder %s1747_s18, %s99_s19 }
  0x64   : >> { %p1752_p6 = por %p1751_p5, %p1750_p4 }
  0x66   : >> { %p1754_p8 = por %p1753_p7, %p1752_p6 }
  0x68   : >> { %p1755_p9 = pnand %p1754_p8, %p1748_p3 }
  0x6a   : >> { %1758 = shalt.err (!%p1755_p9)  }
  0x6b   : >> { %s1759_s27 = scalar_lea.vmem %s109_s12, 16  ;;  %s1944_s28 = smov [#allocation3]  }
  0x6c   : >> { %p1760_p10 = scmp.ne.s32.totalorder %s109_s12, %s1759_s27  ;;  %s1761_s29 = sshll.u32 %s1944_s28, 4  ;;  %s1762_s29 = int_to_ptr.vmem [resolvable:$false] %s1761_s29 }
  0x6d   : >> { %s1763_s30 = scalar_lea.vmem %s1762_s29, 4096  ;;  %p1764_p11 = scmp.lt.s32.totalorder %s109_s12, %s1762_s29 }
  0x6e   : >> { %p1765_p12 = scmp.lt.s32.totalorder %s1763_s30, %s1759_s27 }
  0x70   : >> { %p1766_p13 = por %p1765_p12, %p1764_p11 }
  0x72   : >> { %p1767_p0 = pnand %p1766_p13, %p1760_p10 }
  0x74   : >> { %1770 = shalt.err (!%p1767_p0)  }
  0x75   : >> { %111 = dma.hbm_to_vmem [thread:$0]  %s99_s19, 16, %s109_s12, [#allocation6] }
  0x76   : >> { %s96_s0 = sadd.s32 1, %s1913_s0  }
  0x77   : >> { %p93_p1 = scmp.ge.s32.totalorder %s96_s0, 128  }
  0x78   : > { %s2057_s6 = smov (%p93_p1), 0  }
  0x79   : > { %95 = sbr.rel (!%p93_p1) target bundleno = 89 (0x59), region = 159 }
  0x80 LB: >> { %s118_s7 = sld [smem:[#allocation11 + %s1917_s6]]  ;;  %s121_s8 = scalar_lea.vmem [#allocation4], %s1917_s6  ;;  %s1917_s6 = sphi %s2057_s6, %s117_s6  }
  0x81   : >> { %s129_s9 = sshll.u32 %s121_s8, 4  ;;  %s130_s9 = int_to_ptr.vmem [resolvable:$true] %s129_s9 }
  0x86   : >> { %s1298_s10 = sshll.u32 %s118_s7, 4 }
  0x87   : >> { %s120_s12 = scalar_lea.hbm %s2897_s4, %s1298_s10 }
  0x88   : >> { %s1771_s0 = scalar_lea.hbm %s120_s12, 16  ;;  %p1774_p4 = scmp.lt.u32.totalorder %s120_s12, %s2897_s4 }
  0x89   : >> { %p1772_p3 = scmp.ne.s32.totalorder %s120_s12, %s1771_s0  ;;  %p1775_p5 = scmp.lt.u32.totalorder %s1749_s22, %s1771_s0 }
  0x8a   : >> { %p1777_p7 = scmp.lt.u32.totalorder %s1771_s0, %s120_s12 }
  0x8b   : >> { %p1776_p6 = por %p1775_p5, %p1774_p4 }
  0x8d   : >> { %p1778_p8 = por %p1777_p7, %p1776_p6 }
  0x8f   : >> { %p1779_p9 = pnand %p1778_p8, %p1772_p3 }
  0x91   : >> { %1782 = shalt.err (!%p1779_p9)  }
  0x92   : >> { %s1783_s18 = scalar_lea.vmem %s130_s9, 16  ;;  %s1945_s20 = smov [#allocation4]  }
  0x93   : >> { %p1784_p10 = scmp.ne.s32.totalorder %s130_s9, %s1783_s18  ;;  %s1785_s21 = sshll.u32 %s1945_s20, 4  ;;  %s1786_s21 = int_to_ptr.vmem [resolvable:$false] %s1785_s21 }
  0x94   : >> { %s1787_s23 = scalar_lea.vmem %s1786_s21, 2048  ;;  %p1788_p11 = scmp.lt.s32.totalorder %s130_s9, %s1786_s21 }
  0x95   : >> { %p1789_p12 = scmp.lt.s32.totalorder %s1787_s23, %s1783_s18 }
  0x97   : >> { %p1790_p13 = por %p1789_p12, %p1788_p11 }
  0x99   : >> { %p1791_p0 = pnand %p1790_p13, %p1784_p10 }
  0x9b   : >> { %1794 = shalt.err (!%p1791_p0)  }
  0x9c   : >> { %132 = dma.hbm_to_vmem [thread:$0]  %s120_s12, 16, %s130_s9, [#allocation7] }
  0x9d   : >> { %s117_s6 = sadd.s32 1, %s1917_s6  }
  0x9e   : >> { %p114_p1 = scmp.ge.s32.totalorder %s117_s6, 128  }
  0xa0   : > { %116 = sbr.rel (!%p114_p1) target bundleno = 128 (0x80), region = 170 }
  0xa7 PF: > { %s133_s24 = sadd.s32 1, %s1905_s2 }
  0xa8   : > { %p1299_p3 = scmp.ge.s32.totalorder %s133_s24, 2 }
  0xa9   : > { %s1334_s25 = sshll.u32 (!%p1299_p3), %s1905_s2, 7  ;;  %s2081_s27 = smov (!%p1299_p3), 0  }
  0xaa   : > { %137 = sbr.rel (%p1299_p3) target bundleno = 257 (0x101), region = 53  ;;  %s2079_s26 = sadd.s32 (!%p1299_p3), 128, %s1334_s25 }
  0xb1 LB: >> { %s1302_s22 = sshll.u32 %s2010_s16, 7  ;;  %s145_s28 = sadd.s32 %s1921_s27, %s2079_s26  ;;  %s1921_s27 = sphi %s2081_s27, %s144_s27  }
  0xb2   : >> { %s150_s29 = sadd.s32 %s1921_s27, %s1302_s22  ;;  %s146_s30 = sld [smem:[#allocation9 + %s145_s28]] }
  0xb3   : >> { %s151_s6 = scalar_lea.vmem [#allocation2], %s150_s29  ;;  %s152_s11 = scalar_lea.sflag [#allocation5], %s2010_s16 }
  0xb4   : >> { %s160_s7 = sshll.u32 %s151_s6, 4  ;;  %s1797_s14 = scalar_lea.hbm %s2896_s3, 1024  ;;  %s161_s7 = int_to_ptr.vmem [resolvable:$true] %s160_s7 }
  0xb8   : >> { %s1301_s8 = sshll.u32 %s146_s30, 4 }
  0xb9   : >> { %s148_s1 = scalar_lea.hbm %s2896_s3, %s1301_s8 }
  0xba   : >> { %s1795_s12 = scalar_lea.hbm %s148_s1, 16  ;;  %p1798_p5 = scmp.lt.u32.totalorder %s148_s1, %s2896_s3 }
  0xbb   : >> { %p1796_p4 = scmp.ne.s32.totalorder %s148_s1, %s1795_s12  ;;  %p1799_p6 = scmp.lt.u32.totalorder %s1797_s14, %s1795_s12 }
  0xbc   : >> { %p1801_p8 = scmp.lt.u32.totalorder %s1795_s12, %s148_s1 }
  0xbd   : >> { %p1800_p7 = por %p1799_p6, %p1798_p5 }
  0xbf   : >> { %p1802_p9 = por %p1801_p8, %p1800_p7 }
  0xc1   : >> { %p1803_p10 = pnand %p1802_p9, %p1796_p4 }
  0xc3   : >> { %1806 = shalt.err (!%p1803_p10)  }
  0xc4   : >> { %s1807_s18 = scalar_lea.vmem %s161_s7, 16  ;;  %s1946_s20 = smov [#allocation2]  }
  0xc5   : >> { %p1808_p11 = scmp.ne.s32.totalorder %s161_s7, %s1807_s18  ;;  %s1809_s21 = sshll.u32 %s1946_s20, 4  ;;  %s1810_s21 = int_to_ptr.vmem [resolvable:$false] %s1809_s21 }
  0xc6   : >> { %s1811_s23 = scalar_lea.vmem %s1810_s21, 4096  ;;  %p1812_p12 = scmp.lt.s32.totalorder %s161_s7, %s1810_s21 }
  0xc7   : >> { %p1813_p13 = scmp.lt.s32.totalorder %s1811_s23, %s1807_s18 }
  0xc9   : >> { %p1814_p0 = por %p1813_p13, %p1812_p12 }
  0xcb   : >> { %p1815_p1 = pnand %p1814_p0, %p1808_p11 }
  0xcd   : >> { %1818 = shalt.err (!%p1815_p1)  }
  0xce   : >> { %163 = dma.hbm_to_vmem [thread:$0]  %s148_s1, 16, %s161_s7, %s152_s11 }
  0xcf   : >> { %s144_s27 = sadd.s32 1, %s1921_s27  }
  0xd0   : >> { %p141_p3 = scmp.ge.s32.totalorder %s144_s27, 128  }
  0xd1   : > { %s2105_s24 = smov (%p141_p3), 0  }
  0xd2   : > { %143 = sbr.rel (!%p141_p3) target bundleno = 177 (0xb1), region = 181 }
  0xd9 LB: >> { %s170_s25 = sadd.s32 %s1925_s24, %s2079_s26  ;;  %s175_s28 = sadd.s32 %s1925_s24, %s1302_s22  ;;  %s1925_s24 = sphi %s2105_s24, %s169_s24  }
  0xda   : >> { %s171_s29 = sld [smem:[#allocation10 + %s170_s25]]  ;;  %s176_s30 = scalar_lea.vmem [#allocation3], %s175_s28 }
  0xdb   : >> { %s185_s6 = sshll.u32 %s176_s30, 4  ;;  %s177_s10 = scalar_lea.sflag [#allocation6], %s2010_s16  ;;  %s186_s6 = int_to_ptr.vmem [resolvable:$true] %s185_s6 }
  0xdc   : >> { %s1821_s0 = scalar_lea.hbm %s2897_s4, 1024 }
  0xe0   : >> { %s1303_s27 = sshll.u32 %s171_s29, 4 }
  0xe1   : >> { %s173_s9 = scalar_lea.hbm %s2897_s4, %s1303_s27 }
  0xe2   : >> { %s1819_s1 = scalar_lea.hbm %s173_s9, 16  ;;  %p1822_p5 = scmp.lt.u32.totalorder %s173_s9, %s2897_s4 }
  0xe3   : >> { %p1820_p4 = scmp.ne.s32.totalorder %s173_s9, %s1819_s1  ;;  %p1823_p6 = scmp.lt.u32.totalorder %s1821_s0, %s1819_s1 }
  0xe4   : >> { %p1825_p8 = scmp.lt.u32.totalorder %s1819_s1, %s173_s9 }
  0xe5   : >> { %p1824_p7 = por %p1823_p6, %p1822_p5 }
  0xe7   : >> { %p1826_p9 = por %p1825_p8, %p1824_p7 }
  0xe9   : >> { %p1827_p10 = pnand %p1826_p9, %p1820_p4 }
  0xeb   : >> { %1830 = shalt.err (!%p1827_p10)  }
  0xec   : >> { %s1831_s17 = scalar_lea.vmem %s186_s6, 16  ;;  %s1947_s19 = smov [#allocation3]  }
  0xed   : >> { %p1832_p11 = scmp.ne.s32.totalorder %s186_s6, %s1831_s17  ;;  %s1833_s18 = sshll.u32 %s1947_s19, 4  ;;  %s1834_s18 = int_to_ptr.vmem [resolvable:$false] %s1833_s18 }
  0xee   : >> { %s1835_s20 = scalar_lea.vmem %s1834_s18, 4096  ;;  %p1836_p12 = scmp.lt.s32.totalorder %s186_s6, %s1834_s18 }
  0xef   : >> { %p1837_p13 = scmp.lt.s32.totalorder %s1835_s20, %s1831_s17 }
  0xf1   : >> { %p1838_p0 = por %p1837_p13, %p1836_p12 }
  0xf3   : >> { %p1839_p1 = pnand %p1838_p0, %p1832_p11 }
  0xf5   : >> { %1842 = shalt.err (!%p1839_p1)  }
  0xf6   : >> { %188 = dma.hbm_to_vmem [thread:$0]  %s173_s9, 16, %s186_s6, %s177_s10 }
  0xf7   : >> { %s169_s24 = sadd.s32 1, %s1925_s24  }
  0xf8   : >> { %p166_p3 = scmp.ge.s32.totalorder %s169_s24, 128  }
  0xfa   : > { %168 = sbr.rel (!%p166_p3) target bundleno = 217 (0xd9), region = 192 }
 0x101 PF: > { %191 = sbr.rel (%p1295_p2) target bundleno = 275 (0x113), region = 79  ;;  %s1927_s21 = smov (!%p1295_p2), 0  }
 0x108 LB: >> { %1893 = dma.done.wait [#allocation7], 16  ;;  %s1929_s21 = sphi %s1927_s21, %s197_s21  }
 0x109   : >> { %1894 = vsyncadd [#allocation7], 4294967280  ;;  %s197_s21 = sadd.s32 1, %s1929_s21  }
 0x10a   : >> { %p194_p4 = scmp.ge.s32.totalorder %s197_s21, 128  }
 0x10c   : > { %196 = sbr.rel (!%p194_p4) target bundleno = 264 (0x108), region = 203 }
 0x113 PF: > { %s1931_s23 = smov 0  }
 0x114 LB: >> { %s207_s16 = scalar_lea.sflag [#allocation5], %s2971_s15  ;;  %s1933_s23 = sphi %s1931_s23, %s206_s23  }
 0x115   : >> { %1895 = dma.done.wait %s207_s16, 16 }
 0x116   : >> { %1896 = vsyncadd %s207_s16, 4294967280  ;;  %s206_s23 = sadd.s32 1, %s1933_s23  }
 0x117   : >> { %p203_p2 = scmp.ge.s32.totalorder %s206_s23, 128  }
 0x118   : > { %s1935_s26 = smov (%p203_p2), 0  }
 0x119   : > { %205 = sbr.rel (!%p203_p2) target bundleno = 276 (0x114), region = 214 }
 0x120 LB: >> { %s217_s22 = scalar_lea.sflag [#allocation6], %s2971_s15  ;;  %s1937_s26 = sphi %s1935_s26, %s216_s26  }
 0x121   : >> { %1897 = dma.done.wait %s217_s22, 16 }
 0x122   : >> { %1898 = vsyncadd %s217_s22, 4294967280  ;;  %s216_s26 = sadd.s32 1, %s1937_s26  }
 0x123   : >> { %p213_p5 = scmp.ge.s32.totalorder %s216_s26, 128  }
 0x124   : > { %v256_v0 = vld [vmem:[#allocation4] sm:$0xff] (%p213_p5)  ;;  %v257_v1 = vld [vmem:[#allocation4 + $0x8] sm:$0xff] (%p213_p5)  ;;  %v258_v2 = vld [vmem:[#allocation4 + $0x10] sm:$0xff] (%p213_p5)  ;;  %s1306_s24 = sshll.u32 (%p213_p5), %s2971_s15, 7  ;;  %s1307_s28 = sshll.u32 (%p213_p5), %s1905_s2, 7 }
 0x125   : > { %215 = sbr.rel (!%p213_p5) target bundleno = 288 (0x120), region = 225  ;;  %v1424_v3 = vpack.c.bf16 (%p213_p5), %v257_v1, %v256_v0  ;;  %v259_v4 = vld [vmem:[#allocation4 + $0x18] sm:$0xff] (%p213_p5)  ;;  %s2133_s25 = scalar_lea.vmem (%p213_p5), [#allocation2], %s1306_s24  ;;  %v260_v8 = vld [vmem:[#allocation4 + $0x20] sm:$0xff] (%p213_p5)  ;;  %v261_v9 = vld [vmem:[#allocation4 + $0x28] sm:$0xff] (%p213_p5) }
 0x126   : > { %v1428_v5 = vpack.c.bf16 (%p213_p5), %v259_v4, %v258_v2  ;;  %v223_v6 = vld [vmem:[%s2133_s25] sm:$0xff] (%p213_p5)  ;;  %v1432_v10 = vpack.c.bf16 (%p213_p5), %v261_v9, %v260_v8  ;;  %v2138_v11 = vld [vmem:[%s2133_s25 + $0x10] sm:$0xff] (%p213_p5)  ;;  %s2140_s15 = scalar_lea.vmem (%p213_p5), [#allocation3], %s1306_s24  ;;  %v2148_v18 = vld [vmem:[%s2133_s25 + $0x8] sm:$0xff] (%p213_p5)  ;;  %s1152_s29 = sld [smem:[#allocation12]] (%p213_p5) }
 0x127   : > { %1425 = vmatprep.subr.bf16.mxu0 (%p213_p5), %v1424_v3  ;;  %1456 = vmatprep.subr.bf16.mxu1 (%p213_p5), %v1424_v3  ;;  %v231_v7 = vld [vmem:[%s2133_s25 + $0x40] sm:$0xff] (%p213_p5)  ;;  %v242_v14 = vld [vmem:[%s2140_s15 + $0x10] sm:$0xff] (%p213_p5)  ;;  %v241_v15 = vld [vmem:[%s2140_s15 + $0x8] sm:$0xff] (%p213_p5)  ;;  %p1480_p6 = scmp.eq.s32.totalorder (%p213_p5), %s1905_s2, 1  ;;  %s1843_s9 = scalar_lea.hbm (%p213_p5), %s2898_s5, 16 }
 0x128   : > { %1427 = vmatpush3.bf16.xpose.msra.mxu0 (%p213_p5), %v1424_v3  ;;  %1464 = vmatpush3.bf16.xpose.msra.mxu1 (%p213_p5), %v1424_v3  ;;  %v240_v12 = vld [vmem:[%s2140_s15] sm:$0xff] (%p213_p5)  ;;  %v243_v16 = vld [vmem:[%s2140_s15 + $0x18] sm:$0xff] (%p213_p5)  ;;  %v274_v17 = vmul.f32 (%p213_p5), %v242_v14, %v2138_v11  ;;  %v262_v20 = vld [vmem:[#allocation4 + $0x30] sm:$0xff] (%p213_p5)  ;;  %v273_v22 = vmul.f32 (%p213_p5), %v241_v15, %v2148_v18  ;;  %p1844_p7 = scmp.ne.s32.totalorder (%p213_p5), %s2898_s5, %s1843_s9  ;;  %p1849_p10 = scmp.lt.u32.totalorder (%p213_p5), %s1843_s9, %s2898_s5 }
 0x129   : > { %1429 = vmatprep.subr.bf16.mxu0 (%p213_p5), %v1428_v5  ;;  %1457 = vmatprep.subr.bf16.mxu1 (%p213_p5), %v1428_v5  ;;  %v272_v13 = vmul.f32 (%p213_p5), %v240_v12, %v223_v6  ;;  %v2151_v19 = vld [vmem:[%s2133_s25 + $0x18] sm:$0xff] (%p213_p5)  ;;  %v244_v24 = vld [vmem:[%s2140_s15 + $0x20] sm:$0xff] (%p213_p5)  ;;  %v245_v25 = vld [vmem:[%s2140_s15 + $0x28] sm:$0xff] (%p213_p5) }
 0x12a   : > { %1400 = vmatprep.mubr.f32.mxu0 (%p213_p5), %v223_v6  ;;  %1412 = vmatprep.mubr.f32.mxu1 (%p213_p5), %v231_v7  ;;  %v263_v21 = vld [vmem:[#allocation4 + $0x38] sm:$0xff] (%p213_p5)  ;;  %v275_v23 = vmul.f32 (%p213_p5), %v243_v16, %v2151_v19  ;;  %v2158_v27 = vld [vmem:[%s2133_s25 + $0x20] sm:$0xff] (%p213_p5)  ;;  %v2161_v28 = vld [vmem:[%s2133_s25 + $0x28] sm:$0xff] (%p213_p5)  ;;  %p1845_p8 = pnand (%p213_p5), %p1844_p7, %p1480_p6 }
 0x12b   : > { %288 = vadd.xlane.f32.xlu0 (%p213_p5), %v272_v13  ;;  %292 = vadd.xlane.f32.xlu1 (%p213_p5), %v274_v17  ;;  %v1436_v26 = vpack.c.bf16 (%p213_p5), %v263_v21, %v262_v20  ;;  %v276_v29 = vmul.f32 (%p213_p5), %v244_v24, %v2158_v27  ;;  %v277_v30 = vmul.f32 (%p213_p5), %v245_v25, %v2161_v28  ;;  %v246_v31 = vld [vmem:[%s2140_s15 + $0x30] sm:$0xff] (%p213_p5)  ;;  %v247_v32 = vld [vmem:[%s2140_s15 + $0x38] sm:$0xff] (%p213_p5)  ;;  %v264_v35 = vld [vmem:[#allocation4 + $0x40] sm:$0xff] (%p213_p5) }
 0x12c   : > { %v2168_v33 = vld [vmem:[%s2133_s25 + $0x30] sm:$0xff]  ;;  %v2171_v34 = vld [vmem:[%s2133_s25 + $0x38] sm:$0xff]  ;;  %v265_v36 = vld [vmem:[#allocation4 + $0x48] sm:$0xff]  ;;  %p1846_p9 = pneg %p1845_p8 }
 0x12d   : > { %v278_v37 = vmul.f32 %v246_v31, %v2168_v33  ;;  %v279_v38 = vmul.f32 %v247_v32, %v2171_v34  ;;  %v248_v39 = vld [vmem:[%s2140_s15 + $0x40] sm:$0xff]  ;;  %v249_v40 = vld [vmem:[%s2140_s15 + $0x48] sm:$0xff]  ;;  %v1440_v41 = vpack.c.bf16 %v265_v36, %v264_v35  ;;  %v250_v45 = vld [vmem:[%s2140_s15 + $0x50] sm:$0xff] }
 0x12e   : > { %v232_v42 = vld [vmem:[%s2133_s25 + $0x48] sm:$0xff]  ;;  %v280_v43 = vmul.f32 %v248_v39, %v231_v7  ;;  %v251_v46 = vld [vmem:[%s2140_s15 + $0x58] sm:$0xff]  ;;  %v233_v47 = vld [vmem:[%s2133_s25 + $0x50] sm:$0xff]  ;;  %p1851_p11 = pnand %p1849_p10, %p1846_p9 }
 0x12f   : > { %290 = vadd.xlane.f32.xlu0 %v273_v22  ;;  %294 = vadd.xlane.f32.xlu1 %v275_v23  ;;  %v281_v44 = vmul.f32 %v249_v40, %v232_v42  ;;  %v234_v48 = vld [vmem:[%s2133_s25 + $0x58] sm:$0xff]  ;;  %v266_v49 = vld [vmem:[#allocation4 + $0x50] sm:$0xff]  ;;  %v282_v51 = vmul.f32 %v250_v45, %v233_v47  ;;  %v252_v53 = vld [vmem:[%s2140_s15 + $0x60] sm:$0xff] }
 0x130   : > { %1431 = vmatpush3.bf16.xpose.msra.mxu0 %v1428_v5  ;;  %1465 = vmatpush3.bf16.xpose.msra.mxu1 %v1428_v5  ;;  %v267_v50 = vld [vmem:[#allocation4 + $0x58] sm:$0xff]  ;;  %v283_v52 = vmul.f32 %v251_v46, %v234_v48  ;;  %v253_v54 = vld [vmem:[%s2140_s15 + $0x68] sm:$0xff]  ;;  %v235_v56 = vld [vmem:[%s2133_s25 + $0x60] sm:$0xff] }
 0x131   : > { %1433 = vmatprep.subr.bf16.mxu0 %v1432_v10  ;;  %1458 = vmatprep.subr.bf16.mxu1 %v1432_v10  ;;  %v1444_v55 = vpack.c.bf16 %v267_v50, %v266_v49  ;;  %v236_v57 = vld [vmem:[%s2133_s25 + $0x68] sm:$0xff]  ;;  %v284_v58 = vmul.f32 %v252_v53, %v235_v56  ;;  %v268_v60 = vld [vmem:[#allocation4 + $0x60] sm:$0xff]  ;;  %v270_v63 = vld [vmem:[#allocation4 + $0x70] sm:$0xff] }
 0x132   : > { %v285_v59 = vmul.f32 %v253_v54, %v236_v57  ;;  %v269_v61 = vld [vmem:[#allocation4 + $0x68] sm:$0xff]  ;;  %v271_v0 = vld [vmem:[#allocation4 + $0x78] sm:$0xff]  ;;  %v237_v2 = vld [vmem:[%s2133_s25 + $0x70] sm:$0xff] }
 0x133   : > { %296 = vadd.xlane.f32.xlu0 %v276_v29  ;;  %298 = vadd.xlane.f32.xlu1 %v277_v30  ;;  %v1448_v62 = vpack.c.bf16 %v269_v61, %v268_v60  ;;  %v1452_v1 = vpack.c.bf16 %v271_v0, %v270_v63  ;;  %v238_v3 = vld [vmem:[%s2133_s25 + $0x78] sm:$0xff]  ;;  %v254_v4 = vld [vmem:[%s2140_s15 + $0x70] sm:$0xff] }
 0x134   : > { %v286_v5 = vmul.f32 %v254_v4, %v237_v2  ;;  %v255_v6 = vld [vmem:[%s2140_s15 + $0x78] sm:$0xff] }
 0x135   : > { %v287_v7 = vmul.f32 %v255_v6, %v238_v3 }
 0x137   : > { %300 = vadd.xlane.f32.xlu0 %v278_v37  ;;  %302 = vadd.xlane.f32.xlu1 %v279_v38 }
 0x138   : > { %1435 = vmatpush3.bf16.xpose.msra.mxu0 %v1432_v10  ;;  %1466 = vmatpush3.bf16.xpose.msra.mxu1 %v1432_v10 }
 0x139   : > { %1437 = vmatprep.subr.bf16.mxu0 %v1436_v26  ;;  %1459 = vmatprep.subr.bf16.mxu1 %v1436_v26 }
 0x13b   : > { %304 = vadd.xlane.f32.xlu0 %v280_v43  ;;  %306 = vadd.xlane.f32.xlu1 %v281_v44 }
 0x13f   : > { %308 = vadd.xlane.f32.xlu0 %v282_v51  ;;  %310 = vadd.xlane.f32.xlu1 %v283_v52 }
 0x140   : > { %1439 = vmatpush3.bf16.xpose.msra.mxu0 %v1436_v26  ;;  %1467 = vmatpush3.bf16.xpose.msra.mxu1 %v1436_v26 }
 0x141   : > { %1441 = vmatprep.subr.bf16.mxu0 %v1440_v41  ;;  %1460 = vmatprep.subr.bf16.mxu1 %v1440_v41 }
 0x143   : > { %312 = vadd.xlane.f32.xlu0 %v284_v58  ;;  %314 = vadd.xlane.f32.xlu1 %v285_v59 }
 0x147   : > { %316 = vadd.xlane.f32.xlu0 %v286_v5  ;;  %318 = vadd.xlane.f32.xlu1 %v287_v7 }
 0x148   : > { %1443 = vmatpush3.bf16.xpose.msra.mxu0 %v1440_v41  ;;  %1468 = vmatpush3.bf16.xpose.msra.mxu1 %v1440_v41 }
 0x149   : > { %1445 = vmatprep.subr.bf16.mxu0 %v1444_v55  ;;  %1461 = vmatprep.subr.bf16.mxu1 %v1444_v55 }
 0x150   : > { %1447 = vmatpush3.bf16.xpose.msra.mxu0 %v1444_v55  ;;  %1469 = vmatpush3.bf16.xpose.msra.mxu1 %v1444_v55 }
 0x151   : > { %1449 = vmatprep.subr.bf16.mxu0 %v1448_v62  ;;  %1462 = vmatprep.subr.bf16.mxu1 %v1448_v62 }
 0x158   : > { %1451 = vmatpush3.bf16.xpose.msra.mxu0 %v1448_v62  ;;  %1470 = vmatpush3.bf16.xpose.msra.mxu1 %v1448_v62 }
 0x159   : > { %1453 = vmatprep.subr.bf16.mxu0 %v1452_v1  ;;  %1463 = vmatprep.subr.bf16.mxu1 %v1452_v1 }
 0x160   : > { %1455 = vmatpush3.bf16.xpose.msra.mxu0 %v1452_v1  ;;  %1471 = vmatpush3.bf16.xpose.msra.mxu1 %v1452_v1 }
 0x167   : > { %1401 = vmatmul.mubr.f32.vlgmr.msra.gmra.mrb[0].mxu0 %v2148_v18  ;;  %1413 = vmatmul.mubr.f32.vlgmr.msra.gmra.mrb[0].mxu1 %v232_v42 }
 0x168   : > { %1403 = vmatprep.mubr.f32.mxu0 %v2138_v11  ;;  %1415 = vmatprep.mubr.f32.mxu1 %v233_v47 }
 0x16b   : > { %1404 = vmatmul.mubr.f32.gmra.mrb[2].mxu0 %v2151_v19  ;;  %1416 = vmatmul.mubr.f32.gmra.mrb[2].mxu1 %v234_v48 }
 0x16c   : > { %1406 = vmatprep.mubr.f32.mxu0 %v2158_v27  ;;  %1418 = vmatprep.mubr.f32.mxu1 %v235_v56 }
 0x16f   : > { %1407 = vmatmul.mubr.f32.gmra.mrb[4].mxu0 %v2161_v28  ;;  %1419 = vmatmul.mubr.f32.gmra.mrb[4].mxu1 %v236_v57  ;;  %v2901_v57 = vlaneseq }
 0x170   : > { %1409 = vmatprep.mubr.f32.mxu0 %v2168_v33  ;;  %1421 = vmatprep.mubr.f32.mxu1 %v237_v2 }
 0x171   : > { %v2245_v4 = vand.u32 127, %v2901_v57 }
 0x173   : > { %1410 = vmatmul.mubr.f32.gmra.mrb[6].mxu0 %v2171_v34  ;;  %1422 = vmatmul.mubr.f32.gmra.mrb[6].mxu1 %v238_v3  ;;  %vm947_vm1 = vcmp.lt.s32.totalorder %v2245_v4, 8 }
 0x23a   : > { %v2197_v8 = vpop.f32.mrb[0].mxu0  ;;  %v2199_v9 = vpop.f32.mrb[0].mxu1 }
 0x23b   : > { %v706_v10 = vand.u32 2147483647, %v2197_v8  ;;  %v714_v11 = vand.u32 2147483647, %v2199_v9  ;;  %v2203_v12 = vpop.f32.mrb[1].mxu0  ;;  %v2205_v13 = vpop.f32.mrb[1].mxu1 }
 0x23c   : > { %v705_v15 = vand.u32 2147483647, %v2203_v12  ;;  %v713_v17 = vand.u32 2147483647, %v2205_v13  ;;  %v914_v6 = vmin.f32 %v2197_v8, 0.0 }
 0x23d   : > { %v722_v14 = vsub.f32 0.0, %v706_v10  ;;  %v730_v16 = vsub.f32 0.0, %v714_v11  ;;  %v913_v11 = vmin.f32 %v2203_v12, 0.0 }
 0x23e   : > { %v2209_v18 = vpop.f32.mrb[2].mxu0  ;;  %v2211_v19 = vpop.f32.mrb[2].mxu1  ;;  %v721_v21 = vsub.f32 0.0, %v705_v15  ;;  %v729_v22 = vsub.f32 0.0, %v713_v17 }
 0x23f   : > { %v739_v20 = vmul.f32 1.442695, %v722_v14  ;;  %v708_v23 = vand.u32 2147483647, %v2209_v18  ;;  %v716_v24 = vand.u32 2147483647, %v2211_v19 }
 0x240   : > { %v737_v25 = vmul.f32 1.442695, %v721_v21  ;;  %v2215_v26 = vpop.f32.mrb[3].mxu0  ;;  %v2217_v27 = vpop.f32.mrb[3].mxu1  ;;  %v755_v28 = vmul.f32 1.442695, %v730_v16 }
 0x241   : > { %1561 = vpow2.f32 %v739_v20  ;;  %v724_v29 = vsub.f32 0.0, %v708_v23  ;;  %v732_v30 = vsub.f32 0.0, %v716_v24  ;;  %v707_v33 = vand.u32 2147483647, %v2215_v26 }
 0x242   : > { %v2219_v31 = vpop.f32.mrb[4].mxu0  ;;  %v2221_v32 = vpop.f32.mrb[4].mxu1  ;;  %v715_v34 = vand.u32 2147483647, %v2217_v27  ;;  %1563 = vpow2.f32 %v737_v25  ;;  %v753_v36 = vmul.f32 1.442695, %v729_v22 }
 0x243   : > { %v2225_v35 = vpop.f32.mrb[5].mxu0  ;;  %v743_v37 = vmul.f32 1.442695, %v724_v29  ;;  %v2227_v38 = vpop.f32.mrb[5].mxu1  ;;  %v759_v39 = vmul.f32 1.442695, %v732_v30 }
 0x244   : > { %v723_v40 = vsub.f32 0.0, %v707_v33  ;;  %v731_v41 = vsub.f32 0.0, %v715_v34  ;;  %v710_v42 = vand.u32 2147483647, %v2219_v31  ;;  %v718_v43 = vand.u32 2147483647, %v2221_v32 }
 0x245   : > { %1565 = vpow2.f32 %v743_v37  ;;  %v709_v44 = vand.u32 2147483647, %v2225_v35  ;;  %v717_v52 = vand.u32 2147483647, %v2227_v38  ;;  %v916_v23 = vmin.f32 %v2209_v18, 0.0 }
 0x246   : > { %v2232_v45 = vpop.f32.mrb[6].mxu0  ;;  %1567 = vpow2.f32 %v755_v28  ;;  %v741_v46 = vmul.f32 1.442695, %v723_v40  ;;  %v757_v47 = vmul.f32 1.442695, %v731_v41  ;;  %v726_v48 = vsub.f32 0.0, %v710_v42 }
 0x247   : > { %v2234_v49 = vpop.f32.mrb[6].mxu1  ;;  %1569 = vpow2.f32 %v753_v36  ;;  %v734_v50 = vsub.f32 0.0, %v718_v43  ;;  %v725_v51 = vsub.f32 0.0, %v709_v44  ;;  %v2237_v53 = vpop.f32.mrb[7].mxu0  ;;  %v712_v55 = vand.u32 2147483647, %v2232_v45 }
 0x248   : > { %1571 = vpow2.f32 %v741_v46  ;;  %v747_v54 = vmul.f32 1.442695, %v726_v48  ;;  %v2240_v56 = vpop.f32.mrb[7].mxu1  ;;  %v733_v60 = vsub.f32 0.0, %v717_v52  ;;  %v720_v62 = vand.u32 2147483647, %v2234_v49 }
 0x249   : > { %1573 = vpow2.f32 %v759_v39  ;;  %v763_v58 = vmul.f32 1.442695, %v734_v50  ;;  %v745_v59 = vmul.f32 1.442695, %v725_v51  ;;  %v728_v61 = vsub.f32 0.0, %v712_v55 }
 0x24a   : > { %1575 = vpow2.f32 %v747_v54  ;;  %v761_v0 = vmul.f32 1.442695, %v733_v60  ;;  %v711_v1 = vand.u32 2147483647, %v2237_v53  ;;  %v736_v3 = vsub.f32 0.0, %v720_v62 }
 0x24b   : > { %v1562_v63 = vpop.eup %1561  ;;  %1577 = vpow2.f32 %v757_v47  ;;  %v751_v2 = vmul.f32 1.442695, %v728_v61  ;;  %v719_v10 = vand.u32 2147483647, %v2240_v56  ;;  %v915_v29 = vmin.f32 %v2215_v26, 0.0 }
 0x24c   : > { %1579 = vpow2.f32 %v745_v59  ;;  %v1564_v5 = vpop.eup %1563  ;;  %v727_v7 = vsub.f32 0.0, %v711_v1  ;;  %v767_v14 = vmul.f32 1.442695, %v736_v3  ;;  %v778_v15 = vadd.f32 1.0, %v1562_v63 }
 0x24d   : > { %1581 = vpow2.f32 %v763_v58  ;;  %v735_v20 = vsub.f32 0.0, %v719_v10  ;;  %v781_v21 = vmul.f32 -0.5, %v1562_v63  ;;  %v769_v24 = vadd.f32 1.0, %v1564_v5 }
 0x24e   : > { %1583 = vpow2.f32 %v751_v2  ;;  %v749_v17 = vmul.f32 1.442695, %v727_v7  ;;  %v772_v25 = vmul.f32 -0.5, %v1564_v5  ;;  %v918_v36 = vmin.f32 %v2219_v31, 0.0 }
 0x24f   : > { %v2250_v16 = vpop.eup %1565  ;;  %1585 = vpow2.f32 %v761_v0  ;;  %v765_v30 = vmul.f32 1.442695, %v735_v20  ;;  %v917_v37 = vmin.f32 %v2225_v35, 0.0  ;;  %v784_v39 = vand.u32 2147483647, %v1562_v63 }
 0x250   : > { %v2252_v22 = vpop.eup %1567  ;;  %1587 = vpow2.f32 %v767_v14  ;;  %v796_v33 = vadd.f32 1.0, %v2250_v16  ;;  %v782_v41 = vadd.f32 1.0, %v781_v21  ;;  %v775_v42 = vand.u32 2147483647, %v1564_v5 }
 0x251   : > { %v2255_v28 = vpop.eup %1569  ;;  %1589 = vpow2.f32 %v749_v17  ;;  %v773_v46 = vadd.f32 1.0, %v772_v25  ;;  %v799_v47 = vmul.f32 -0.5, %v2250_v16  ;;  %vm2268_vm0 = vcmp.lt.f32.partialorder %v784_v39, 0.0004427343 }
 0x252   : > { %v1572_v34 = vpop.eup %1571  ;;  %1591 = vlog2.f32 %v778_v15  ;;  %v802_v59 = vand.u32 2147483647, %v2250_v16  ;;  %v783_v62 = vmul.f32 %v1562_v63, %v782_v41  ;;  %vm2276_vm2 = vcmp.lt.f32.partialorder %v775_v42, 0.0004427343 }
 0x253   : > { %v2261_v40 = vpop.eup %1573  ;;  %1593 = vpow2.f32 %v765_v30  ;;  %v787_v43 = vadd.f32 1.0, %v1572_v34  ;;  %v790_v48 = vmul.f32 -0.5, %v1572_v34  ;;  %v793_v0 = vand.u32 2147483647, %v1572_v34 }
 0x254   : > { %v1576_v44 = vpop.eup %1575  ;;  %1595 = vlog2.f32 %v769_v24  ;;  %v774_v3 = vmul.f32 %v1564_v5, %v773_v46  ;;  %v800_v10 = vadd.f32 1.0, %v799_v47  ;;  %vm2284_vm3 = vcmp.lt.f32.partialorder %v802_v59, 0.0004427343 }
 0x255   : > { %v2264_v50 = vpop.eup %1577  ;;  %1597 = vlog2.f32 %v796_v33  ;;  %v814_v54 = vadd.f32 1.0, %v1576_v44  ;;  %v817_v60 = vmul.f32 -0.5, %v1576_v44  ;;  %v791_v14 = vadd.f32 1.0, %v790_v48 }
 0x256   : > { %v1580_v55 = vpop.eup %1579  ;;  %1599 = vlog2.f32 %v787_v43  ;;  %v820_v20 = vand.u32 2147483647, %v1576_v44  ;;  %vm2290_vm4 = vcmp.lt.f32.partialorder %v793_v0, 0.0004427343  ;;  %v850_v43 = vadd.f32 1.0, %v2252_v22 }
 0x257   : > { %v2273_v61 = vpop.eup %1581  ;;  %1601 = vlog2.f32 %v814_v54  ;;  %v805_v1 = vadd.f32 1.0, %v1580_v55  ;;  %v808_v15 = vmul.f32 -0.5, %v1580_v55  ;;  %v818_v5 = vadd.f32 1.0, %v817_v60 }
 0x258   : > { %v1584_v2 = vpop.eup %1583  ;;  %v811_v33 = vand.u32 2147483647, %v1580_v55  ;;  %v801_v47 = vmul.f32 %v2250_v16, %v800_v10  ;;  %v792_v48 = vmul.f32 %v1572_v34, %v791_v14  ;;  %vm2299_vm5 = vcmp.lt.f32.partialorder %v820_v20, 0.0004427343 }
 0x259   : > { %v2280_v17 = vpop.eup %1585  ;;  %1603 = vlog2.f32 %v805_v1  ;;  %v832_v21 = vadd.f32 1.0, %v1584_v2  ;;  %v835_v63 = vmul.f32 -0.5, %v1584_v2  ;;  %v809_v30 = vadd.f32 1.0, %v808_v15 }
 0x25a   : > { %v2282_v24 = vpop.eup %1587  ;;  %v838_v42 = vand.u32 2147483647, %v1584_v2  ;;  %v853_v0 = vmul.f32 -0.5, %v2252_v22  ;;  %v819_v57 = vmul.f32 %v1576_v44, %v818_v5  ;;  %vm2304_vm6 = vcmp.lt.f32.partialorder %v811_v33, 0.0004427343 }
 0x25b   : > { %v2288_v39 = vpop.eup %1589  ;;  %1605 = vlog2.f32 %v832_v21  ;;  %v836_v54 = vadd.f32 1.0, %v835_v63  ;;  %v810_v52 = vmul.f32 %v1580_v55, %v809_v30  ;;  %v841_v63 = vadd.f32 1.0, %v2255_v28 }
 0x25c   : > { %v1592_v46 = vpop.eup %1591  ;;  %v823_v59 = vadd.f32 1.0, %v2288_v39  ;;  %1607 = vlog2.f32 %v850_v43  ;;  %vm2310_vm7 = vcmp.lt.f32.partialorder %v838_v42, 0.0004427343  ;;  %v826_v20 = vmul.f32 -0.5, %v2288_v39 }
 0x25d   : > { %v2297_v60 = vpop.eup %1593  ;;  %v780_v1 = vmul.f32 0.6931472, %v1592_v46  ;;  %v837_v30 = vmul.f32 %v1584_v2, %v836_v54  ;;  %v829_v33 = vand.u32 2147483647, %v2288_v39  ;;  %v854_v42 = vadd.f32 1.0, %v853_v0 }
 0x25e   : > { %v1596_v21 = vpop.eup %1595  ;;  %1609 = vlog2.f32 %v823_v59  ;;  %v856_v7 = vand.u32 2147483647, %v2252_v22  ;;  %v827_v41 = vadd.f32 1.0, %v826_v20  ;;  %v2918_v35 = vmin.f32 %v2232_v45, 0.0 }
 0x25f   : > { %v1598_v16 = vpop.eup %1597  ;;  %v786_v34 = vsel %vm2268_vm0, %v783_v62, %v780_v1  ;;  %v771_v10 = vmul.f32 0.6931472, %v1596_v21  ;;  %1611 = vlog2.f32 %v841_v63  ;;  %v844_v1 = vmul.f32 -0.5, %v2255_v28 }
 0x260   : > { %v1600_v44 = vpop.eup %1599  ;;  %v930_v55 = vsub.f32 %v786_v34, %v914_v6  ;;  %v798_v5 = vmul.f32 0.6931472, %v1598_v16  ;;  %v855_v34 = vmul.f32 %v2252_v22, %v854_v42  ;;  %vm2351_vm8 = vcmp.lt.f32.partialorder %v856_v7, 0.0004427343 }
 0x261   : > { %v1602_v43 = vpop.eup %1601  ;;  %v777_v58 = vsel %vm2276_vm2, %v774_v3, %v771_v10  ;;  %v789_v62 = vmul.f32 0.6931472, %v1600_v44  ;;  %v828_v63 = vmul.f32 %v2288_v39, %v827_v41  ;;  %v871_v44 = vmul.f32 -0.5, %v2261_v40 }
 0x262   : > { %v949_v46 = vsel %vm947_vm1, %v930_v55, 0.0  ;;  %v929_v59 = vsub.f32 %v777_v58, %v913_v11  ;;  %v804_v8 = vsel %vm2284_vm3, %v801_v47, %v798_v5  ;;  %v816_v6 = vmul.f32 0.6931472, %v1602_v43 }
 0x263   : > { %v1604_v2 = vpop.eup %1603  ;;  %966 = vadd.xlane.f32.xlu1 %v949_v46  ;;  %v932_v54 = vsub.f32 %v804_v8, %v916_v23  ;;  %v795_v3 = vsel %vm2290_vm4, %v792_v48, %v789_v62  ;;  %v845_v48 = vadd.f32 1.0, %v844_v1  ;;  %vm830_vm9 = vcmp.lt.f32.partialorder %v829_v33, 0.0004427343 }
 0x264   : > { %v948_v12 = vsel %vm947_vm1, %v929_v59, 0.0  ;;  %v931_v11 = vsub.f32 %v795_v3, %v915_v29  ;;  %v822_v25 = vsel %vm2299_vm5, %v819_v57, %v816_v6  ;;  %v807_v47 = vmul.f32 0.6931472, %v1604_v2 }
 0x265   : > { %v1606_v0 = vpop.eup %1605  ;;  %964 = vadd.xlane.f32.xlu0 %v948_v12  ;;  %v951_v18 = vsel %vm947_vm1, %v932_v54, 0.0  ;;  %v934_v23 = vsub.f32 %v822_v25, %v918_v36  ;;  %v868_v57 = vadd.f32 1.0, %v2261_v40  ;;  %v847_v36 = vand.u32 2147483647, %v2255_v28 }
 0x266   : > { %v950_v21 = vsel %vm947_vm1, %v931_v11, 0.0  ;;  %v813_v26 = vsel %vm2304_vm6, %v810_v52, %v807_v47  ;;  %v834_v29 = vmul.f32 0.6931472, %v1606_v0  ;;  %v1608_v15 = vpop.eup %1607  ;;  %v846_v5 = vmul.f32 %v2255_v28, %v845_v48 }
 0x267   : > { %970 = vadd.xlane.f32.xlu1 %v951_v18  ;;  %v933_v16 = vsub.f32 %v813_v26, %v917_v37  ;;  %v953_v51 = vsel %vm947_vm1, %v934_v23, 0.0  ;;  %v852_v20 = vmul.f32 0.6931472, %v1608_v15  ;;  %1613 = vlog2.f32 %v868_v57 }
 0x268   : > { %v1610_v10 = vpop.eup %1609  ;;  %v840_v52 = vsel %vm2310_vm7, %v837_v30, %v834_v29  ;;  %v859_v14 = vadd.f32 1.0, %v2264_v50  ;;  %v922_v43 = vmin.f32 %v2199_v9, 0.0  ;;  %vm2371_vm10 = vcmp.lt.f32.partialorder %v847_v36, 0.0004427343 }
 0x269   : > { %968 = vadd.xlane.f32.xlu0 %v950_v21  ;;  %v936_v37 = vsub.f32 %v840_v52, %v2918_v35  ;;  %v825_v22 = vmul.f32 0.6931472, %v1610_v10  ;;  %v952_v55 = vsel %vm947_vm1, %v933_v16, 0.0  ;;  %v1612_v30 = vpop.eup %1611  ;;  %v858_v45 = vsel %vm2351_vm8, %v855_v34, %v852_v20 }
 0x26a   : > { %v2921_v33 = vmin.f32 %v2237_v53, 0.0  ;;  %v843_v42 = vmul.f32 0.6931472, %v1612_v30  ;;  %1615 = vlog2.f32 %v859_v14  ;;  %v921_v46 = vmin.f32 %v2205_v13, 0.0 }
 0x26b   : > { %974 = vadd.xlane.f32.xlu1 %v953_v51  ;;  %v831_v58 = vsel %vm830_vm9, %v828_v63, %v825_v22  ;;  %v955_v62 = vsel %vm947_vm1, %v936_v37, 0.0  ;;  %v872_v9 = vadd.f32 1.0, %v871_v44  ;;  %v862_v59 = vmul.f32 -0.5, %v2264_v50 }
 0x26c   : > { %v935_v28 = vsub.f32 %v831_v58, %v2921_v33  ;;  %v886_v8 = vadd.f32 1.0, %v2273_v61  ;;  %v938_v2 = vsub.f32 %v858_v45, %v922_v43  ;;  %v849_v54 = vsel %vm2371_vm10, %v846_v5, %v843_v42 }
 0x26d   : > { %972 = vadd.xlane.f32.xlu0 %v952_v55  ;;  %v874_v53 = vand.u32 2147483647, %v2261_v40  ;;  %v937_v3 = vsub.f32 %v849_v54, %v921_v46  ;;  %v889_v13 = vmul.f32 -0.5, %v2273_v61  ;;  %v877_v7 = vadd.f32 1.0, %v2280_v17 }
 0x26e   : > { %v954_v6 = vsel %vm947_vm1, %v935_v28, 0.0  ;;  %1617 = vlog2.f32 %v886_v8  ;;  %v873_v1 = vmul.f32 %v2261_v40, %v872_v9  ;;  %v863_v12 = vadd.f32 1.0, %v862_v59 }
 0x26f   : > { %978 = vadd.xlane.f32.xlu1 %v955_v62  ;;  %v904_v11 = vadd.f32 1.0, %v2282_v24  ;;  %v957_v47 = vsel %vm947_vm1, %v938_v2, 0.0  ;;  %vm2393_vm11 = vcmp.lt.f32.partialorder %v874_v53, 0.0004427343  ;;  %v865_v18 = vand.u32 2147483647, %v2264_v50 }
 0x270   : > { %1619 = vlog2.f32 %v877_v7  ;;  %v880_v41 = vmul.f32 -0.5, %v2280_v17  ;;  %v895_v40 = vadd.f32 1.0, %v2297_v60  ;;  %v924_v48 = vmin.f32 %v2211_v19, 0.0  ;;  %v2439_v7 = vpop.xlane.xlu0 %288 }
 0x271   : > { %976 = vadd.xlane.f32.xlu0 %v954_v6  ;;  %v1614_v25 = vpop.eup %1613  ;;  %1621 = vlog2.f32 %v904_v11  ;;  %v956_v21 = vsel %vm947_vm1, %v937_v3, 0.0  ;;  %v890_v26 = vadd.f32 1.0, %v889_v13  ;;  %v907_v29 = vmul.f32 -0.5, %v2282_v24 }
 0x272   : > { %v870_v23 = vmul.f32 0.6931472, %v1614_v25  ;;  %v864_v15 = vmul.f32 %v2264_v50, %v863_v12  ;;  %v892_v16 = vand.u32 2147483647, %v2273_v61  ;;  %1623 = vlog2.f32 %v895_v40 }
 0x273   : > { %982 = vadd.xlane.f32.xlu1 %v957_v47  ;;  %vm866_vm12 = vcmp.lt.f32.partialorder %v865_v18, 0.0004427343  ;;  %v898_v19 = vmul.f32 -0.5, %v2297_v60  ;;  %v923_v36 = vmin.f32 %v2217_v27, 0.0  ;;  %v881_v51 = vadd.f32 1.0, %v880_v41 }
 0x274   : > { %v876_v57 = vsel %vm2393_vm11, %v873_v1, %v870_v23  ;;  %v1616_v34 = vpop.eup %1615  ;;  %v891_v20 = vmul.f32 %v2273_v61, %v890_v26  ;;  %v883_v35 = vand.u32 2147483647, %v2280_v17  ;;  %v908_v50 = vadd.f32 1.0, %v907_v29  ;;  %v2441_v1 = vpop.xlane.xlu1 %292 }
 0x275   : > { %980 = vadd.xlane.f32.xlu0 %v956_v21  ;;  %v940_v31 = vsub.f32 %v876_v57, %v924_v48  ;;  %v861_v10 = vmul.f32 0.6931472, %v1616_v34  ;;  %vm893_vm13 = vcmp.lt.f32.partialorder %v892_v16, 0.0004427343  ;;  %v910_v63 = vand.u32 2147483647, %v2282_v24 }
 0x276   : > { %v899_v5 = vadd.f32 1.0, %v898_v19  ;;  %v926_v27 = vmin.f32 %v2221_v32, 0.0  ;;  %v882_v14 = vmul.f32 %v2280_v17, %v881_v51  ;;  %v901_v30 = vand.u32 2147483647, %v2297_v60 }
 0x277   : > { %v959_v52 = vsel %vm947_vm1, %v940_v31, 0.0  ;;  %v867_v22 = vsel %vm866_vm12, %v864_v15, %v861_v10  ;;  %vm2420_vm14 = vcmp.lt.f32.partialorder %v883_v35, 0.0004427343  ;;  %v909_v39 = vmul.f32 %v2282_v24, %v908_v50 }
 0x278   : > { %v1618_v37 = vpop.eup %1617  ;;  %986 = vadd.xlane.f32.xlu1 %v959_v52  ;;  %v939_v44 = vsub.f32 %v867_v22, %v923_v36  ;;  %vm911_vm15 = vcmp.lt.f32.partialorder %v910_v63, 0.0004427343  ;;  %v925_v32 = vmin.f32 %v2227_v38, 0.0  ;;  %v900_v42 = vmul.f32 %v2297_v60, %v899_v5  ;;  %v2445_v12 = vpop.xlane.xlu1 %294 }
 0x279   : > { %v888_v55 = vmul.f32 0.6931472, %v1618_v37  ;;  %v928_v9 = vmin.f32 %v2234_v49, 0.0  ;;  %vm902_vm0 = vcmp.lt.f32.partialorder %v901_v30, 0.0004427343  ;;  %v927_v54 = vmin.f32 %v2240_v56, 0.0  ;;  %v2443_v56 = vpop.xlane.xlu0 %290 }
 0x27a   : > { %v1620_v43 = vpop.eup %1619  ;;  %v958_v61 = vsel %vm947_vm1, %v939_v44, 0.0  ;;  %v466_v47 = vand.u32 2147483647, %v2443_v56  ;;  %v465_v4 = vand.u32 2147483647, %v2439_v7  ;;  %v2926_v34 = vlaneseq }
 0x27b   : > { %v894_v58 = vsel %vm893_vm13, %v891_v20, %v888_v55  ;;  %v1622_v62 = vpop.eup %1621  ;;  %984 = vadd.xlane.f32.xlu0 %v958_v61  ;;  %v879_v28 = vmul.f32 0.6931472, %v1620_v43  ;;  %v468_v41 = vand.u32 2147483647, %v2445_v12  ;;  %v467_v15 = vand.u32 2147483647, %v2441_v1 }
 0x27c   : > { %v942_v33 = vsub.f32 %v894_v58, %v926_v27  ;;  %v906_v17 = vmul.f32 0.6931472, %v1622_v62  ;;  %v1624_v46 = vpop.eup %1623  ;;  %v2449_v25 = vpop.xlane.xlu1 %298  ;;  %v482_v23 = vsub.f32 0.0, %v466_v47  ;;  %v481_v48 = vsub.f32 0.0, %v465_v4 }
 0x27d   : > { %v885_v8 = vsel %vm2420_vm14, %v882_v14, %v879_v28  ;;  %v897_v2 = vmul.f32 0.6931472, %v1624_v46  ;;  %v2447_v11 = vpop.xlane.xlu0 %296  ;;  %v484_v29 = vsub.f32 0.0, %v468_v41  ;;  %v2466_v31 = vshrl.u32 %v2926_v34, 7 }
 0x27e   : > { %v961_v59 = vsel %vm947_vm1, %v942_v33, 0.0  ;;  %v941_v24 = vsub.f32 %v885_v8, %v925_v32  ;;  %v912_v6 = vsel %vm911_vm15, %v909_v39, %v906_v17  ;;  %v499_v21 = vmul.f32 1.442695, %v482_v23 }
 0x27f   : > { %990 = vadd.xlane.f32.xlu1 %v961_v59  ;;  %v944_v38 = vsub.f32 %v912_v6, %v928_v9  ;;  %v903_v53 = vsel %vm902_vm0, %v900_v42, %v897_v2  ;;  %v497_v57 = vmul.f32 1.442695, %v481_v48  ;;  %v503_v19 = vmul.f32 1.442695, %v484_v29 }
 0x280   : > { %v960_v60 = vsel %vm947_vm1, %v941_v24, 0.0  ;;  %v943_v3 = vsub.f32 %v903_v53, %v927_v54  ;;  %v2454_v18 = vpop.xlane.xlu1 %302  ;;  %1625 = vpow2.f32 %v499_v21  ;;  %v469_v36 = vand.u32 2147483647, %v2447_v11 }
 0x281   : > { %988 = vadd.xlane.f32.xlu0 %v960_v60  ;;  %v963_v49 = vsel %vm947_vm1, %v944_v38, 0.0  ;;  %v2452_v0 = vpop.xlane.xlu0 %300  ;;  %v470_v10 = vand.u32 2147483647, %v2449_v25  ;;  %1627 = vpow2.f32 %v497_v57  ;;  %v483_v52 = vsub.f32 0.0, %v467_v15 }
 0x282   : > { %v962_v13 = vsel %vm947_vm1, %v943_v3, 0.0  ;;  %v471_v20 = vand.u32 2147483647, %v2452_v0  ;;  %v999_v35 = vadd.s32 8, %v2466_v31  ;;  %1629 = vpow2.f32 %v503_v19 }
 0x283   : > { %994 = vadd.xlane.f32.xlu1 %v963_v49  ;;  %v485_v50 = vsub.f32 0.0, %v469_v36  ;;  %v472_v37 = vand.u32 2147483647, %v2454_v18  ;;  %v2478_v63 = vstv %s1307_s28  ;;  %v486_v44 = vsub.f32 0.0, %v470_v10 }
 0x284   : > { %v2460_v26 = vpop.xlane.xlu1 %306  ;;  %v501_v5 = vmul.f32 1.442695, %v483_v52  ;;  %v487_v27 = vsub.f32 0.0, %v471_v20  ;;  %v1016_v43 = vadd.s32 %v2478_v63, %v999_v35  ;;  %v673_v62 = vmin.f32 %v2439_v7, 0.0 }
 0x285   : > { %992 = vadd.xlane.f32.xlu0 %v962_v13  ;;  %v2458_v40 = vpop.xlane.xlu0 %304  ;;  %v474_v14 = vand.u32 2147483647, %v2460_v26  ;;  %v505_v58 = vmul.f32 1.442695, %v485_v50  ;;  %v488_v45 = vsub.f32 0.0, %v472_v37  ;;  %v675_v33 = vmin.f32 %v2441_v1, 0.0 }
 0x286   : > { %v473_v55 = vand.u32 2147483647, %v2458_v40  ;;  %v507_v28 = vmul.f32 1.442695, %v486_v44  ;;  %1631 = vpow2.f32 %v501_v5  ;;  %v509_v17 = vmul.f32 1.442695, %v487_v27 }
 0x287   : > { %v490_v42 = vsub.f32 0.0, %v474_v14  ;;  %v674_v59 = vmin.f32 %v2443_v56, 0.0  ;;  %vm1032_vm1 = vcmp.lt.s32.totalorder %v1016_v43, 200  ;;  %1633 = vpow2.f32 %v505_v58 }
 0x288   : > { %v2470_v51 = vpop.xlane.xlu1 %310  ;;  %v489_v32 = vsub.f32 0.0, %v473_v55  ;;  %v511_v2 = vmul.f32 1.442695, %v488_v45  ;;  %v676_v60 = vmin.f32 %v2445_v12, 0.0  ;;  %1635 = vpow2.f32 %v507_v28 }
 0x289   : > { %v2463_v16 = vpop.xlane.xlu0 %308  ;;  %v476_v46 = vand.u32 2147483647, %v2470_v51  ;;  %1637 = vpow2.f32 %v509_v17  ;;  %v515_v47 = vmul.f32 1.442695, %v490_v42  ;;  %v1948_v23 = vmov 0.0  }
 0x28a   : > { %v2485_v61 = vpop.eup %1625  ;;  %v475_v39 = vand.u32 2147483647, %v2463_v16  ;;  %v513_v53 = vmul.f32 1.442695, %v489_v32  ;;  %v2507_v41 = vsel %vm1032_vm1, 1.0, %v1948_v23  ;;  %v677_v48 = vmin.f32 %v2447_v11, 0.0 }
 0x28b   : > { %v538_v24 = vadd.f32 1.0, %v2485_v61  ;;  %v2496_v6 = vpop.eup %1627  ;;  %v492_v4 = vsub.f32 0.0, %v476_v46  ;;  %v678_v19 = vmin.f32 %v2449_v25, 0.0  ;;  %v541_v44 = vmul.f32 -0.5, %v2485_v61 }
 0x28c   : > { %v2482_v30 = vpop.xlane.xlu1 %314  ;;  %v491_v54 = vsub.f32 0.0, %v475_v39  ;;  %v2503_v13 = vpop.eup %1629  ;;  %v529_v29 = vadd.f32 1.0, %v2496_v6  ;;  %v544_v45 = vand.u32 2147483647, %v2485_v61  ;;  %v532_v17 = vmul.f32 -0.5, %v2496_v6 }
 0x28d   : > { %v2476_v22 = vpop.xlane.xlu0 %312  ;;  %v478_v38 = vand.u32 2147483647, %v2482_v30  ;;  %1639 = vlog2.f32 %v538_v24  ;;  %v556_v10 = vadd.f32 1.0, %v2503_v13  ;;  %v519_v35 = vmul.f32 1.442695, %v492_v4 }
 0x28e   : > { %v477_v8 = vand.u32 2147483647, %v2476_v22  ;;  %1641 = vpow2.f32 %v511_v2  ;;  %v517_v57 = vmul.f32 1.442695, %v491_v54  ;;  %vm2537_vm2 = vcmp.lt.f32.partialorder %v544_v45, 0.0004427343 }
 0x28f   : > { %v494_v15 = vsub.f32 0.0, %v478_v38  ;;  %1643 = vpow2.f32 %v513_v53  ;;  %v1015_v53 = vadd.s32 %v2478_v63, %v2466_v31  ;;  %v559_v4 = vmul.f32 -0.5, %v2503_v13 }
 0x290   : > { %v2501_v3 = vpop.xlane.xlu1 %318  ;;  %v493_v21 = vsub.f32 0.0, %v477_v8  ;;  %1645 = vpow2.f32 %v515_v47  ;;  %v2518_v55 = vpop.eup %1631  ;;  %v542_v8 = vadd.f32 1.0, %v541_v44  ;;  %v1003_v43 = vadd.s32 40, %v2466_v31 }
 0x291   : > { %v2491_v9 = vpop.xlane.xlu0 %316  ;;  %v480_v34 = vand.u32 2147483647, %v2501_v3  ;;  %1647 = vlog2.f32 %v529_v29  ;;  %v523_v27 = vmul.f32 1.442695, %v494_v15  ;;  %v2523_v39 = vpop.eup %1633  ;;  %v547_v24 = vadd.f32 1.0, %v2518_v55 }
 0x292   : > { %v479_v49 = vand.u32 2147483647, %v2491_v9  ;;  %v521_v37 = vmul.f32 1.442695, %v493_v21  ;;  %1649 = vpow2.f32 %v517_v57  ;;  %v2528_v42 = vpop.eup %1635  ;;  %v1001_v21 = vadd.s32 24, %v2466_v31 }
 0x293   : > { %v496_v14 = vsub.f32 0.0, %v480_v34  ;;  %1651 = vlog2.f32 %v556_v10  ;;  %v2532_v2 = vpop.eup %1637  ;;  %v533_v57 = vadd.f32 1.0, %v532_v17  ;;  %v535_v15 = vand.u32 2147483647, %v2496_v6 }
 0x294   : > { %v495_v36 = vsub.f32 0.0, %v479_v49  ;;  %1653 = vpow2.f32 %v519_v35  ;;  %v1000_v34 = vadd.s32 16, %v2466_v31  ;;  %v543_v35 = vmul.f32 %v2485_v61, %v542_v8 }
 0x295   : > { %1655 = vpow2.f32 %v521_v37  ;;  %v527_v54 = vmul.f32 1.442695, %v496_v14  ;;  %v562_v37 = vand.u32 2147483647, %v2503_v13  ;;  %v550_v44 = vmul.f32 -0.5, %v2518_v55 }
 0x296   : > { %v525_v58 = vmul.f32 1.442695, %v495_v36  ;;  %1657 = vpow2.f32 %v523_v27  ;;  %v574_v36 = vadd.f32 1.0, %v2528_v42  ;;  %vm1031_vm3 = vcmp.lt.s32.totalorder %v1015_v53, 200 }
 0x297   : > { %v1640_v49 = vpop.eup %1639  ;;  %v560_v17 = vadd.f32 1.0, %v559_v4  ;;  %v1018_v38 = vadd.s32 %v2478_v63, %v1001_v21  ;;  %v553_v32 = vand.u32 2147483647, %v2518_v55  ;;  %v577_v61 = vmul.f32 -0.5, %v2528_v42 }
 0x298   : > { %1659 = vpow2.f32 %v525_v58  ;;  %v2543_v29 = vpop.eup %1641  ;;  %v540_v14 = vmul.f32 0.6931472, %v1640_v49  ;;  %v565_v58 = vadd.f32 1.0, %v2523_v39  ;;  %vm2562_vm4 = vcmp.lt.f32.partialorder %v535_v15, 0.0004427343 }
 0x299   : > { %v2548_v10 = vpop.eup %1643  ;;  %1661 = vlog2.f32 %v547_v24  ;;  %v534_v24 = vmul.f32 %v2496_v6, %v533_v57  ;;  %v2568_v49 = vsel %vm1031_vm3, 1.0, %v1948_v23  ;;  %vm2570_vm5 = vcmp.lt.f32.partialorder %v562_v37, 0.0004427343 }
 0x29a   : > { %v2553_v27 = vpop.eup %1645  ;;  %1663 = vpow2.f32 %v527_v54  ;;  %v1017_v54 = vadd.s32 %v2478_v63, %v1000_v34  ;;  %v551_v21 = vadd.f32 1.0, %v550_v44  ;;  %v546_v6 = vsel %vm2537_vm2, %v543_v35, %v540_v14 }
 0x29b   : > { %v1648_v45 = vpop.eup %1647  ;;  %1665 = vlog2.f32 %v574_v36  ;;  %v592_v15 = vadd.f32 1.0, %v2543_v29  ;;  %v561_v36 = vmul.f32 %v2503_v13, %v560_v17  ;;  %vm1034_vm6 = vcmp.lt.s32.totalorder %v1018_v38, 200 }
 0x29c   : > { %v2559_v8 = vpop.eup %1649  ;;  %v531_v57 = vmul.f32 0.6931472, %v1648_v45  ;;  %1667 = vlog2.f32 %v565_v58  ;;  %vm2583_vm7 = vcmp.lt.f32.partialorder %v553_v32, 0.0004427343  ;;  %v578_v44 = vadd.f32 1.0, %v577_v61 }
 0x29d   : > { %v1652_v53 = vpop.eup %1651  ;;  %vm1033_vm8 = vcmp.lt.s32.totalorder %v1017_v54, 200  ;;  %v568_v47 = vmul.f32 -0.5, %v2523_v39  ;;  %v583_v35 = vadd.f32 1.0, %v2532_v2  ;;  %v2595_v58 = vsub.f32 %v546_v6, %v674_v59 }
 0x29e   : > { %v2575_v28 = vpop.eup %1653  ;;  %v558_v5 = vmul.f32 0.6931472, %v1652_v53  ;;  %v580_v13 = vand.u32 2147483647, %v2528_v42  ;;  %v1020_v32 = vadd.s32 %v2478_v63, %v1003_v43  ;;  %v1002_v38 = vadd.s32 32, %v2466_v31 }
 0x29f   : > { %v2580_v34 = vpop.eup %1655  ;;  %v537_v45 = vsel %vm2562_vm4, %v534_v24, %v531_v57  ;;  %v2603_v17 = vsel %vm1034_vm6, 1.0, %v1948_v23  ;;  %v552_v61 = vmul.f32 %v2518_v55, %v551_v21  ;;  %1669 = vlog2.f32 %v592_v15 }
 0x2a0   : > { %v2587_v50 = vpop.eup %1657  ;;  %v2607_v56 = vsel %vm1033_vm8, 1.0, %v1948_v23  ;;  %v579_v59 = vmul.f32 %v2528_v42, %v578_v44  ;;  %v595_v53 = vmul.f32 -0.5, %v2543_v29  ;;  %v1005_v43 = vadd.s32 56, %v2466_v31 }
 0x2a1   : > { %v564_v46 = vsel %vm2570_vm5, %v561_v36, %v558_v5  ;;  %v569_v24 = vadd.f32 1.0, %v568_v47  ;;  %v571_v57 = vand.u32 2147483647, %v2523_v39  ;;  %1671 = vlog2.f32 %v583_v35 }
 0x2a2   : > { %v2591_v14 = vpop.eup %1659  ;;  %vm2617_vm9 = vcmp.lt.f32.partialorder %v580_v13, 0.0004427343  ;;  %vm1036_vm10 = vcmp.lt.s32.totalorder %v1020_v32, 200  ;;  %v1019_v42 = vadd.s32 %v2478_v63, %v1002_v38  ;;  %v610_v21 = vadd.f32 1.0, %v2553_v27 }
 0x2a3   : > { %v1662_v54 = vpop.eup %1661  ;;  %v598_v52 = vand.u32 2147483647, %v2543_v29  ;;  %v586_v4 = vmul.f32 -0.5, %v2532_v2  ;;  %v1004_v5 = vadd.s32 48, %v2466_v31  ;;  %v2628_v36 = vsub.f32 %v537_v45, %v673_v62 }
 0x2a4   : > { %v2612_v6 = vpop.eup %1663  ;;  %v549_v44 = vmul.f32 0.6931472, %v1662_v54  ;;  %v2632_v47 = vsub.f32 %v564_v46, %v676_v60  ;;  %v596_v35 = vadd.f32 1.0, %v595_v53  ;;  %v1022_v13 = vadd.s32 %v2478_v63, %v1005_v43 }
 0x2a5   : > { %v1666_v15 = vpop.eup %1665  ;;  %v2636_v38 = vsel %vm1036_vm10, 1.0, %v1948_v23  ;;  %v570_v54 = vmul.f32 %v2523_v39, %v569_v24  ;;  %vm2639_vm11 = vcmp.lt.f32.partialorder %v571_v57, 0.0004427343  ;;  %v1007_v7 = vadd.s32 72, %v2466_v31 }
 0x2a6   : > { %v1668_v32 = vpop.eup %1667  ;;  %v576_v62 = vmul.f32 0.6931472, %v1666_v15  ;;  %vm1035_vm12 = vcmp.lt.s32.totalorder %v1019_v42, 200  ;;  %v589_v12 = vand.u32 2147483647, %v2532_v2  ;;  %1673 = vlog2.f32 %v610_v21 }
 0x2a7   : > { %v555_v60 = vsel %vm2583_vm7, %v552_v61, %v549_v44  ;;  %vm2647_vm13 = vcmp.lt.f32.partialorder %v598_v52, 0.0004427343  ;;  %v587_v53 = vadd.f32 1.0, %v586_v4  ;;  %v1021_v39 = vadd.s32 %v2478_v63, %v1004_v5 }
 0x2a8   : > { %v567_v43 = vmul.f32 0.6931472, %v1668_v32  ;;  %v597_v46 = vmul.f32 %v2543_v29, %v596_v35  ;;  %vm1038_vm14 = vcmp.lt.s32.totalorder %v1022_v13, 200  ;;  %v613_v24 = vmul.f32 -0.5, %v2553_v27 }
 0x2a9   : > { %v1670_v57 = vpop.eup %1669  ;;  %v2655_v42 = vsel %vm1035_vm12, 1.0, %v1948_v23  ;;  %v1024_v37 = vadd.s32 %v2478_v63, %v1007_v7  ;;  %v604_v52 = vmul.f32 -0.5, %v2548_v10  ;;  %v1006_v61 = vadd.s32 64, %v2466_v31 }
 0x2aa   : > { %v2662_v21 = vsub.f32 %v555_v60, %v675_v33  ;;  %v582_v29 = vsel %vm2617_vm9, %v579_v59, %v576_v62  ;;  %vm2666_vm15 = vcmp.lt.f32.partialorder %v589_v12, 0.0004427343  ;;  %v601_v44 = vadd.f32 1.0, %v2548_v10 }
 0x2ab   : > { %v1672_v4 = vpop.eup %1671  ;;  %v2672_v5 = vsel %vm1038_vm14, 1.0, %v1948_v23  ;;  %v588_v35 = vmul.f32 %v2532_v2, %v587_v53  ;;  %vm1037_vm0 = vcmp.lt.s32.totalorder %v1021_v39, 200  ;;  %v616_v1 = vand.u32 2147483647, %v2553_v27 }
 0x2ac   : > { %v573_v33 = vsel %vm2639_vm11, %v570_v54, %v567_v43  ;;  %v594_v55 = vmul.f32 0.6931472, %v1670_v57  ;;  %v614_v59 = vadd.f32 1.0, %v613_v24  ;;  %v1009_v13 = vadd.s32 88, %v2466_v31 }
 0x2ad   : > { %vm1111_vm1 = vcmask 7168   ;;  %v2681_v32 = vsub.f32 %v582_v29, %v678_v19  ;;  %vm1040_vm2 = vcmp.lt.s32.totalorder %v1024_v37, 200  ;;  %v605_v7 = vadd.f32 1.0, %v604_v52 }
 0x2ae   : > { %v1023_v62 = vadd.s32 %v2478_v63, %v1006_v61  ;;  %v585_v2 = vmul.f32 0.6931472, %v1672_v4  ;;  %v2685_v12 = vsel %vm1037_vm0, 1.0, %v1948_v23  ;;  %1675 = vlog2.f32 %v601_v44 }
 0x2af   : > { %v628_v20 = vadd.f32 1.0, %v2575_v28  ;;  %v2690_v54 = vsub.f32 %v573_v33, %v677_v48  ;;  %vm2692_vm3 = vcmp.lt.f32.partialorder %v616_v1, 0.0004427343  ;;  %v607_v25 = vand.u32 2147483647, %v2548_v10 }
 0x2b0   : > { %v631_v19 = vmul.f32 -0.5, %v2575_v28  ;;  %v1674_v53 = vpop.eup %1673  ;;  %v600_v39 = vsel %vm2647_vm13, %v597_v46, %v594_v55  ;;  %v615_v43 = vmul.f32 %v2553_v27, %v614_v59  ;;  %v2702_v24 = vsel %vm1040_vm2, 1.0, %v1948_v23 }
 0x2b1   : > { %v1026_v11 = vadd.s32 %v2478_v63, %v1009_v13  ;;  %v2706_v57 = vmul.f32 %v2548_v10, %v605_v7  ;;  %vm1039_vm4 = vcmp.lt.s32.totalorder %v1023_v62, 200  ;;  %v622_v37 = vmul.f32 -0.5, %v2559_v8 }
 0x2b2   : > { %v1008_v52 = vadd.s32 80, %v2466_v31  ;;  %v591_v45 = vsel %vm2666_vm15, %v588_v35, %v585_v2  ;;  %1677 = vlog2.f32 %v628_v20  ;;  %v619_v27 = vadd.f32 1.0, %v2559_v8 }
 0x2b3   : > { %v2945_v29 = vmin.f32 %v2454_v18, 0.0  ;;  %v612_v4 = vmul.f32 0.6931472, %v1674_v53  ;;  %v632_v10 = vadd.f32 1.0, %v631_v19  ;;  %v634_v1 = vand.u32 2147483647, %v2575_v28 }
 0x2b4   : > { %vm2719_vm5 = vcmp.lt.f32.partialorder %v607_v25, 0.0004427343  ;;  %v2724_v15 = vsel %vm1039_vm4, 1.0, %v1948_v23  ;;  %vm1042_vm6 = vcmp.lt.s32.totalorder %v1026_v11, 200  ;;  %v2948_v18 = vmin.f32 %v2452_v0, 0.0 }
 0x2b5   : > { %v696_v44 = vsub.f32 %v600_v39, %v2945_v29  ;;  %v623_v13 = vadd.f32 1.0, %v622_v37  ;;  %v625_v7 = vand.u32 2147483647, %v2559_v8  ;;  %v1025_v62 = vadd.s32 %v2478_v63, %v1008_v52 }
 0x2b6   : > { %v695_v59 = vsub.f32 %v591_v45, %v2948_v18  ;;  %1679 = vlog2.f32 %v619_v27  ;;  %v646_v2 = vadd.f32 1.0, %v2587_v50  ;;  %v618_v25 = vsel %vm2692_vm3, %v615_v43, %v612_v4 }
 0x2b7   : > { %v2736_v19 = vmul.f32 %v2575_v28, %v632_v10  ;;  %v2739_v0 = vsel %vm1042_vm6, 1.0, %v1948_v23  ;;  %v649_v53 = vmul.f32 -0.5, %v2587_v50  ;;  %vm2745_vm7 = vcmp.lt.f32.partialorder %v634_v1, 0.0004427343 }
 0x2b8   : > { %v1676_v39 = vpop.eup %1675  ;;  %v637_v60 = vadd.f32 1.0, %v2580_v34  ;;  %v2751_v43 = vmul.f32 %v2559_v8, %v623_v13  ;;  %vm1041_vm8 = vcmp.lt.s32.totalorder %v1025_v62, 200  ;;  %v652_v37 = vand.u32 2147483647, %v2587_v50 }
 0x2b9   : > { %v664_v52 = vadd.f32 1.0, %v2612_v6  ;;  %1681 = vlog2.f32 %v646_v2  ;;  %v2951_v29 = vmin.f32 %v2460_v26, 0.0  ;;  %v603_v10 = vmul.f32 0.6931472, %v1676_v39 }
 0x2ba   : > { %v650_v8 = vadd.f32 1.0, %v649_v53  ;;  %vm2762_vm9 = vcmp.lt.f32.partialorder %v625_v7, 0.0004427343  ;;  %1683 = vlog2.f32 %v637_v60  ;;  %v2769_v26 = vsel %vm1041_vm8, 1.0, %v1948_v23 }
 0x2bb   : > { %v698_v4 = vsub.f32 %v618_v25, %v2951_v29  ;;  %v1011_v18 = vadd.s32 104, %v2466_v31  ;;  %1685 = vlog2.f32 %v664_v52  ;;  %vm2782_vm10 = vcmp.lt.f32.partialorder %v652_v37, 0.0004427343 }
 0x2bc   : > { %v1678_v1 = vpop.eup %1677  ;;  %v2779_v62 = vmul.f32 %v2587_v50, %v650_v8  ;;  %v1010_v50 = vadd.s32 96, %v2466_v31 }
 0x2bd   : > { %v630_v25 = vmul.f32 0.6931472, %v1678_v1 }
 0x2c0   : > { %v1680_v53 = vpop.eup %1679 }
 0x2f0   : > { %v967_v48 = vpop.xlane.xlu1 %966 }
 0x2f1   : > { %v1080_v61 = vadd.f32 %v967_v48, %v2595_v58  ;;  %v2788_v58 = vadd.s32 %v2478_v63, %v1011_v18 }
 0x2f2   : > { %v965_v46 = vpop.xlane.xlu0 %964 }
 0x2f3   : > { %v1096_v33 = vmul.f32 %v2507_v41, %v1080_v61  ;;  %v1079_v55 = vadd.f32 %v965_v46, %v2628_v36  ;;  %vm1044_vm11 = vcmp.lt.s32.totalorder %v2788_v58, 200 }
 0x2f4   : > { %v971_v35 = vpop.xlane.xlu1 %970 }
 0x2f5   : > { %v1095_v41 = vmul.f32 %v2568_v49, %v1079_v55  ;;  %v1082_v36 = vadd.f32 %v971_v35, %v2632_v47  ;;  %v1113_v49 = vsel %vm1111_vm1, %v1096_v33, 0.0  ;;  %v2960_v35 = vmin.f32 %v2463_v16, 0.0 }
 0x2f6   : > { %v969_v20 = vpop.xlane.xlu0 %968 }
 0x2f7   : > { %v1112_v47 = vsel %vm1111_vm1, %v1095_v41, 0.0  ;;  %v1081_v11 = vadd.f32 %v969_v20, %v2662_v21  ;;  %v1098_v61 = vmul.f32 %v2603_v17, %v1082_v36  ;;  %v655_v17 = vadd.f32 1.0, %v2591_v14 }
 0x2f8   : > { %v975_v28 = vpop.xlane.xlu1 %974  ;;  %v1114_v27 = vadd.f32 %v1113_v49, %v1112_v47  ;;  %v609_v20 = vsel %vm2719_vm5, %v2706_v57, %v603_v10  ;;  %v643_v57 = vand.u32 2147483647, %v2580_v34 }
 0x2f9   : > { %v1097_v45 = vmul.f32 %v2607_v56, %v1081_v11  ;;  %v1084_v21 = vadd.f32 %v975_v28, %v2681_v32  ;;  %v1117_v13 = vsel %vm1111_vm1, %v1098_v61, 0.0  ;;  %1687 = vlog2.f32 %v655_v17 }
 0x2fa   : > { %v973_v46 = vpop.xlane.xlu0 %972  ;;  %v2956_v28 = vmin.f32 %v2458_v40, 0.0  ;;  %vm2803_vm12 = vcmp.lt.f32.partialorder %v643_v57, 0.0004427343  ;;  %v2967_v40 = vmin.f32 %v2501_v3, 0.0 }
 0x2fb   : > { %v1115_v33 = vsel %vm1111_vm1, %v1097_v45, 0.0  ;;  %v1083_v55 = vadd.f32 %v973_v46, %v2690_v54  ;;  %v1100_v54 = vmul.f32 %v2636_v38, %v1084_v21  ;;  %v640_v38 = vmul.f32 -0.5, %v2580_v34  ;;  %v1682_v46 = vpop.eup %1681 }
 0x2fc   : > { %v1116_v56 = vadd.f32 %v1115_v33, %v1114_v27  ;;  %v979_v32 = vpop.xlane.xlu1 %978  ;;  %v697_v37 = vsub.f32 %v609_v20, %v2956_v28  ;;  %v636_v45 = vsel %vm2745_vm7, %v2736_v19, %v630_v25  ;;  %v621_v21 = vmul.f32 0.6931472, %v1680_v53  ;;  %v1684_v48 = vpop.eup %1683 }
 0x2fd   : > { %v1099_v7 = vmul.f32 %v2655_v42, %v1083_v55  ;;  %v1086_v41 = vadd.f32 %v979_v32, %v696_v44  ;;  %v1121_v11 = vsel %vm1111_vm1, %v1100_v54, 0.0  ;;  %v667_v27 = vmul.f32 -0.5, %v2612_v6  ;;  %v1686_v32 = vpop.eup %1685 }
 0x2fe   : > { %v1118_v36 = vadd.f32 %v1117_v13, %v1116_v56  ;;  %v977_v2 = vpop.xlane.xlu0 %976  ;;  %v658_v19 = vmul.f32 -0.5, %v2591_v14  ;;  %v670_v56 = vand.u32 2147483647, %v2612_v6  ;;  %v627_v54 = vsel %vm2762_vm9, %v2751_v43, %v621_v21 }
 0x2ff   : > { %v1119_v39 = vsel %vm1111_vm1, %v1099_v7, 0.0  ;;  %v1085_v49 = vadd.f32 %v977_v2, %v695_v59  ;;  %v1102_v59 = vmul.f32 %v2672_v5, %v1086_v41  ;;  %v641_v5 = vadd.f32 1.0, %v640_v38 }
 0x300   : > { %v1120_v42 = vadd.f32 %v1119_v39, %v1118_v36  ;;  %v983_v44 = vpop.xlane.xlu1 %982  ;;  %v648_v7 = vmul.f32 0.6931472, %v1682_v46  ;;  %v668_v41 = vadd.f32 1.0, %v667_v27  ;;  %v639_v25 = vmul.f32 0.6931472, %v1684_v48 }
 0x301   : > { %v1101_v60 = vmul.f32 %v2685_v12, %v1085_v49  ;;  %v1088_v10 = vadd.f32 %v983_v44, %v698_v4  ;;  %v1027_v12 = vadd.s32 %v2478_v63, %v1010_v50  ;;  %v1125_v33 = vsel %vm1111_vm1, %v1102_v59, 0.0 }
 0x302   : > { %v1122_v52 = vadd.f32 %v1121_v11, %v1120_v42  ;;  %v981_v61 = vpop.xlane.xlu0 %980  ;;  %v2959_v4 = vmin.f32 %v2470_v51, 0.0  ;;  %v661_v51 = vand.u32 2147483647, %v2591_v14  ;;  %v642_v53 = vmul.f32 %v2580_v34, %v641_v5 }
 0x303   : > { %v1123_v29 = vsel %vm1111_vm1, %v1101_v60, 0.0  ;;  %v1087_v8 = vadd.f32 %v981_v61, %v697_v37  ;;  %v1104_v36 = vmul.f32 %v2702_v24, %v1088_v10  ;;  %v659_v39 = vadd.f32 1.0, %v658_v19  ;;  %v1688_v49 = vpop.eup %1687 }
 0x304   : > { %v1124_v1 = vadd.f32 %v1123_v29, %v1122_v52  ;;  %v700_v17 = vsub.f32 %v636_v45, %v2959_v4  ;;  %v699_v43 = vsub.f32 %v627_v54, %v2960_v35  ;;  %vm1043_vm13 = vcmp.lt.s32.totalorder %v1027_v12, 200 }
 0x305   : > { %v1103_v55 = vmul.f32 %v2724_v15, %v1087_v8  ;;  %v987_v13 = vpop.xlane.xlu1 %986  ;;  %v1013_v15 = vadd.s32 120, %v2466_v31  ;;  %v1012_v42 = vadd.s32 112, %v2466_v31  ;;  %v654_v44 = vsel %vm2782_vm10, %v2779_v62, %v648_v7 }
 0x306   : > { %v1126_v18 = vadd.f32 %v1125_v33, %v1124_v1  ;;  %v1090_v38 = vadd.f32 %v987_v13, %v700_v17  ;;  %v666_v57 = vmul.f32 0.6931472, %v1686_v32  ;;  %v669_v50 = vmul.f32 %v2612_v6, %v668_v41 }
 0x307   : > { %v1127_v2 = vsel %vm1111_vm1, %v1103_v55, 0.0  ;;  %vm2829_vm14 = vcmp.lt.f32.partialorder %v670_v56, 0.0004427343  ;;  %v1129_v34 = vsel %vm1111_vm1, %v1104_v36, 0.0  ;;  %v1030_v16 = vadd.s32 %v2478_v63, %v1013_v15 }
 0x308   : > { %v1128_v20 = vadd.f32 %v1127_v2, %v1126_v18  ;;  %v985_v24 = vpop.xlane.xlu0 %984  ;;  %vm2835_vm15 = vcmp.lt.f32.partialorder %v661_v51, 0.0004427343  ;;  %v645_v62 = vsel %vm2803_vm12, %v642_v53, %v639_v25  ;;  %v657_v47 = vmul.f32 0.6931472, %v1688_v49 }
 0x309   : > { %v1089_v59 = vadd.f32 %v985_v24, %v699_v43  ;;  %v660_v6 = vmul.f32 %v2591_v14, %v659_v39  ;;  %v1106_v28 = vmul.f32 %v2739_v0, %v1090_v38  ;;  %v2965_v52 = vmin.f32 %v2482_v30, 0.0 }
 0x30a   : > { %v1130_v31 = vadd.f32 %v1129_v34, %v1128_v20  ;;  %v1029_v21 = vadd.s32 %v2478_v63, %v1012_v42  ;;  %v687_v27 = vmin.f32 %v2491_v9, 0.0  ;;  %v672_v46 = vsel %vm2829_vm14, %v669_v50, %v666_v57 }
 0x30b   : > { %v1105_v37 = vmul.f32 %v2769_v26, %v1089_v59  ;;  %v702_v61 = vsub.f32 %v654_v44, %v2965_v52  ;;  %v1321_v14 = vsel %vm1044_vm11, 1.0, %v1948_v23  ;;  %v2966_v26 = vmin.f32 %v2476_v22, 0.0 }
 0x30c   : > { %v991_v45 = vpop.xlane.xlu1 %990  ;;  %v1320_v8 = vsel %vm1043_vm13, 1.0, %v1948_v23  ;;  %vm1046_vm0 = vcmp.lt.s32.totalorder %v1030_v16, 200  ;;  %v663_v9 = vsel %vm2835_vm15, %v660_v6, %v657_v47  ;;  %v1133_v5 = vsel %vm1111_vm1, %v1106_v28, 0.0 }
 0x30d   : > { %v1131_v29 = vsel %vm1111_vm1, %v1105_v37, 0.0  ;;  %v1092_v0 = vadd.f32 %v991_v45, %v702_v61  ;;  %v701_v10 = vsub.f32 %v645_v62, %v2966_v26  ;;  %v704_v58 = vsub.f32 %v672_v46, %v2967_v40 }
 0x30e   : > { %v1132_v30 = vadd.f32 %v1131_v29, %v1130_v31  ;;  %v989_v63 = vpop.xlane.xlu0 %988  ;;  %vm1045_vm2 = vcmp.lt.s32.totalorder %v1029_v21, 200  ;;  %v703_v4 = vsub.f32 %v663_v9, %v687_v27  ;;  %v1323_v12 = vsel %vm1046_vm0, 1.0, %v1948_v23 }
 0x30f   : > { %v1091_v1 = vadd.f32 %v989_v63, %v701_v10  ;;  %v1108_v22 = vmul.f32 %v1321_v14, %v1092_v0  ;;  %v1322_v17 = vsel %vm1045_vm2, 1.0, %v1948_v23 }
 0x310   : > { %v995_v19 = vpop.xlane.xlu1 %994  ;;  %v1134_v48 = vadd.f32 %v1133_v5, %v1132_v30 }
 0x311   : > { %v1107_v33 = vmul.f32 %v1320_v8, %v1091_v1  ;;  %v1094_v55 = vadd.f32 %v995_v19, %v704_v58  ;;  %v1137_v54 = vsel %vm1111_vm1, %v1108_v22, 0.0 }
 0x312   : > { %v993_v56 = vpop.xlane.xlu0 %992 }
 0x313   : > { %v1135_v32 = vsel %vm1111_vm1, %v1107_v33, 0.0  ;;  %v1093_v18 = vadd.f32 %v993_v56, %v703_v4  ;;  %v1110_v3 = vmul.f32 %v1323_v12, %v1094_v55 }
 0x314   : > { %v1136_v13 = vadd.f32 %v1135_v32, %v1134_v48 }
 0x315   : > { %v1109_v7 = vmul.f32 %v1322_v17, %v1093_v18  ;;  %v1141_v15 = vsel %vm1111_vm1, %v1110_v3, 0.0 }
 0x316   : > { %v1138_v41 = vadd.f32 %v1137_v54, %v1136_v13 }
 0x317   : > { %v1139_v36 = vsel %vm1111_vm1, %v1109_v7, 0.0 }
 0x318   : > { %v1140_v2 = vadd.f32 %v1139_v36, %v1138_v41 }
 0x31a   : > { %v1142_v51 = vadd.f32 %v1141_v15, %v1140_v2 }
 0x31c   : > { %1143 = vadd.xlane.f32.xlu0 %v1142_v51 }
 0x3a9   : > { %v1144_v23 = vpop.xlane.xlu0 %1143 }
 0x3aa   : > { %v1145_v20 = vrot.slane %v1144_v23, 4 }
 0x3ac   : > { %v1146_v25 = vadd.f32 %v1145_v20, %v1144_v23 }
 0x3ae   : > { %v1147_v53 = vrot.slane %v1146_v25, 2 }
 0x3b0   : > { %v1148_v39 = vadd.f32 %v1147_v53, %v1146_v25 }
 0x3b2   : > { %v1149_v49 = vrot.slane %v1148_v39, 1 }
 0x3b4   : > { %v1150_v38 = vadd.f32 %v1149_v49, %v1148_v39 }
 0x3b6   : > { %1472 = vpush %v1150_v38 }
 0x3e7   : > { %s1473_s30 = spop %1472 }
 0x3e8   : > { %s1153_s6 = sadd.f32 %s1473_s30, %s1152_s29 }
 0x3ea   : > { %1155 = sst [smem:[#allocation12]] %s1153_s6  ;;  %s1163_s27 = smul.f32 0.005, %s1153_s6 }
 0x3ec   : > { %1475 = sst [smem:[#allocation12]] (%p1480_p6), %s1163_s27 }
 0x3ed   : > { %1854 = shalt.err (!%p1851_p11)
}
 0x3ee   : > { %s1949_s0 = smov [#allocation12]  }
 0x3ef   : > { %1477 = dma.smem_to_hbm (%p1480_p6), %s1949_s0, 16, %s2898_s5, [#allocation13]  }
 0x3f0   : > { %1900 = dma.done.wait (%p1480_p6), [#allocation13], 16  }
 0x3f1   : > { %1902 = vsyncadd (%p1480_p6), [#allocation13], 4294967280 }
 0x3f2   : > { %1178 = sfence }
 0x3f3 PF: > { %s28_s2 = sadd.s32 1, %s1905_s2  }
 0x3f4   : > { %p25_p12 = scmp.ge.s32.totalorder %s28_s2, 3  }
 0x3f6   :  { %27 = sbr.rel (!%p25_p12) target bundleno = 34 (0x22), region = 236 }
 0x3fd   :  { %1184 = vsyncpa [#allocation13], 1 }
 0x3fe   :  { %1186 = vsyncpa [#allocation13 + $0x1], 1 }
 0x3ff   :  { %1187 = vsyncmov [#allocation5] }
 0x402   :  { %s1188_s17 = vpop.sfrf %1187 }
 0x403   :  { %p1329_p13 = scmp.ne.s32.totalorder %s1188_s17, 0 }
 0x405   :  { %1192 = shalt.err (%p1329_p13)  }
 0x406   :  { %1194 = vsyncmov [#allocation5 + $0x1] }
 0x409   :  { %s1195_s19 = vpop.sfrf %1194 }
 0x40a   :  { %p1330_p0 = scmp.ne.s32.totalorder %s1195_s19, 0 }
 0x40c   :  { %1199 = shalt.err (%p1330_p0)  }
 0x40d   :  { %1200 = vsyncmov [#allocation6] }
 0x410   :  { %s1201_s18 = vpop.sfrf %1200 }
 0x411   :  { %p1331_p1 = scmp.ne.s32.totalorder %s1201_s18, 0 }
 0x413   :  { %1205 = shalt.err (%p1331_p1)  }
 0x414   :  { %1207 = vsyncmov [#allocation6 + $0x1] }
 0x417   :  { %s1208_s20 = vpop.sfrf %1207 }
 0x418   :  { %p1332_p3 = scmp.ne.s32.totalorder %s1208_s20, 0 }
 0x41a   :  { %1212 = shalt.err (%p1332_p3)  }
 0x41b   :  { %1213 = vsyncmov [#allocation7] }
 0x41e   :  { %s1214_s2 = vpop.sfrf %1213 }
 0x41f   :  { %p1333_p4 = scmp.ne.s32.totalorder %s1214_s2, 0 }
 0x421   :  { %1218 = shalt.err (%p1333_p4)  }

</bundles_post_ra>
